<compile_context>
chip_gen: v6e
topology: v6e:2x2x1
jax: 0.10.0
libtpu: 0.0.40
codegen_flags: <defaults>
</compile_context>

<pallas_src>
import functools

import jax
import jax.numpy as jnp
from jax.experimental import pallas as pl
from jax.experimental.pallas import tpu as pltpu

# ---- module constants (from GCMI.__init__ defaults) ----
TEMPERATURE = 0.2
IOU_THRESHOLD = 0.5
LAMDA = 1.0
NUM_CLASSES = 20
NUM_NOVEL = 5
NOVEL_MIN = NUM_CLASSES - NUM_NOVEL  # 15


def _reweight(option):
    if option == "none":
        return lambda iou: jnp.ones_like(iou)
    if option == "linear":
        return lambda iou: iou
    if option == "exp":
        return lambda iou: jnp.exp(iou) - 1.0
    raise ValueError(option)


def _gcmi_kernel(feat_row_ref, featT_ref, colsum_ref, w_ref, out_ref, *, m_total, scale):
    # (tm, K) bf16 row tile fed straight to the MXU (no per-element pre-scale).
    lhs = feat_row_ref[...]
    # (tm, M) raw similarities; f32 MXU accumulate.
    sim = jnp.dot(lhs, featT_ref[...], preferred_element_type=jnp.float32)
    # Only remaining cross-lane (XLU) reduction: the row max.
    row_max = jnp.max(sim, axis=1, keepdims=True)                          # (tm, 1)
    # sum_j f_i.f_j == f_i . (sum_j f_j): MXU matvec instead of a (tm, M) lane sum.
    row_sum = jnp.dot(lhs, colsum_ref[...], preferred_element_type=jnp.float32)  # (tm, 1)
    # loss_row = -(2*lamda/T) * (row_sum - M*row_max), masked by (novel & iou>=thr).
    contrib = w_ref[...] * (jnp.float32(m_total) * row_max - row_sum)      # (tm, 1)
    part = jnp.float32(scale) * jnp.sum(contrib)                           # per-tile partial sum
    # Lane-dense, (8,128)-aligned output block (value replicated; wrapper reads [0, 0]).
    out_ref[...] = jnp.broadcast_to(part, out_ref.shape)


def _num_tensorcores():
    try:
        kind = jax.devices()[0].device_kind.lower()
    except Exception:
        return 1
    return 2 if ("v7" in kind or "7x" in kind) else 1


def _pick_tile(m):
    """Largest row tile that (a) gives every TensorCore a tile and (b) keeps the
    (tm, M) f32 sim intermediate modest; always a divisor of M and 8-aligned."""
    tm, nsteps = m, 1
    min_steps = _num_tensorcores()
    while tm % 16 == 0 and (nsteps < min_steps or tm * m * 4 > (8 << 20)):
        tm //= 2
        nsteps *= 2
    return tm


def gcmi_pallas(features, labels, ious, *, tm=None, reweight_func="none"):
    M, K = features.shape
    features = features.astype(jnp.float32)
    if tm is None:
        tm = _pick_tile(M)
    tm = min(tm, M)
    assert M % tm == 0 and (tm == M or tm % 8 == 0), (M, tm)
    n_tiles = M // tm

    # bf16 MXU operands (cast folded into the transpose so the XLA transpose moves half
    # the bytes); f32 accumulation happens inside the kernel.
    feat_bf = features.astype(jnp.bfloat16)                    # (M, K) row tiles (LHS)
    feat_t = feat_bf.T                                         # (K, M) resident RHS
    # Column sum for the row_sum matvec (computed in f32, fed to the MXU as bf16).
    colsum = jnp.sum(features, axis=0).reshape(K, 1).astype(jnp.bfloat16)

    ious_f = ious.astype(jnp.float32)
    keep = jnp.logical_and(labels.astype(jnp.float32) >= NOVEL_MIN, ious_f >= IOU_THRESHOLD)
    w_col = keep.astype(jnp.float32).reshape(M, 1)             # combined (novel & keep) weight

    kernel = functools.partial(
        _gcmi_kernel, m_total=M, scale=2.0 * LAMDA / TEMPERATURE)

    # VMEM budget: resident bf16 RHS (double-buffered by the pipeline), bf16 LHS tiles,
    # the (tm, M) f32 sim intermediate, padded (., 1) columns, plus headroom.
    est = (2 * K * M * 2 + 2 * tm * K * 2 + 2 * K * 128 * 2
           + 2 * tm * 128 * 4 + 2 * 8 * 128 * 4 + tm * M * 4)
    vmem_limit = int(min(48 << 20, max(32 << 20, 2 * est)))    # stays under v7x's 64 MiB

    per_tile = pl.pallas_call(
        kernel,
        out_shape=jax.ShapeDtypeStruct((n_tiles * 8, 128), jnp.float32),
        grid_spec=pltpu.PrefetchScalarGridSpec(
            num_scalar_prefetch=0,
            grid=(n_tiles,),
            in_specs=[
                pl.BlockSpec((tm, K), lambda i: (i, 0)),       # bf16 feature row tile (LHS)
                pl.BlockSpec((K, M), lambda i: (0, 0)),        # bf16 features.T, resident
                pl.BlockSpec((K, 1), lambda i: (0, 0)),        # bf16 column sum, resident
                pl.BlockSpec((tm, 1), lambda i: (i, 0)),       # f32 combined weight column
            ],
            out_specs=pl.BlockSpec((8, 128), lambda i: (i, 0)),
        ),
        compiler_params=pltpu.CompilerParams(
            dimension_semantics=("parallel",),                 # no cross-tile state
            vmem_limit_bytes=vmem_limit),
        cost_estimate=pl.CostEstimate(
            flops=2 * M * M * K + 2 * M * K,
            transcendentals=0,
            bytes_accessed=2 * M * K + 2 * K * M + 2 * K + 4 * M + n_tiles * 8 * 128 * 4),
    )(feat_bf, feat_t, colsum, w_col)

    # Tiny O(M) epilogue in plain JAX (keep-count, reweight coef, final division).
    loss_sum = jnp.sum(per_tile[0::8, 0])
    cnt = jnp.sum(keep).astype(jnp.float32)        # NaN if no row survives, same as torch mean([])
    loss_mean = loss_sum / cnt
    # torch `loss * coef` broadcasts (n,1)*(n,) -> (n,n); its mean factorizes:
    coef = _reweight(reweight_func)(ious_f)
    coef_mean = jnp.sum(jnp.where(keep, coef, 0.0)) / cnt
    return loss_mean * coef_mean


# ------------------------------ pure-JAX references ------------------------------
def gcmi_ref_literal(features, labels, ious, reweight_func="none"):
    """Line-by-line port of the torch forward (well-defined when every label is novel)."""
    keep_novel = labels >= NOVEL_MIN
    feat_novel = features[keep_novel]
    similarity = jnp.dot(feat_novel, features.T,
                         precision=jax.lax.Precision.HIGHEST) / TEMPERATURE
    sim_row_max = jnp.max(similarity, axis=1, keepdims=True)
    similarity = similarity - sim_row_max
    log_prob = 2.0 * LAMDA * jnp.sum(similarity, axis=1, keepdims=True)
    keep = ious >= IOU_THRESHOLD
    per_label_log_prob = log_prob[keep]
    loss = -per_label_log_prob
    coef = _reweight(reweight_func)(ious)
    coef = coef[keep]
    loss = loss * coef          # (n,1)*(n,) -> (n,n), exactly as in torch
    return jnp.mean(loss)


def gcmi_ref_general(features, labels, ious, reweight_func="none"):
    """Masked generalization (equals the literal forward when all labels are novel)."""
    novel = labels >= NOVEL_MIN
    sim = jnp.dot(features, features.T,
                  precision=jax.lax.Precision.HIGHEST) / TEMPERATURE
    log_prob = 2.0 * LAMDA * jnp.sum(sim - jnp.max(sim, axis=1, keepdims=True), axis=1)
    keep = novel & (ious >= IOU_THRESHOLD)
    cnt = jnp.sum(keep).astype(jnp.float32)
    loss_mean = jnp.sum(jnp.where(keep, -log_prob, 0.0)) / cnt
    coef = _reweight(reweight_func)(ious)
    coef_mean = jnp.sum(jnp.where(keep, coef, 0.0)) / cnt
    return loss_mean * coef_mean


if __name__ == "__main__":
    M, K = 512, 128
    key = jax.random.PRNGKey(0)
    k1, k2, k3, k4 = jax.random.split(key, 4)
    feats = jax.random.normal(k1, (M, K), dtype=jnp.float32)
    feats = feats / jnp.linalg.norm(feats, axis=1, keepdims=True)   # cosine-style features
    ious = jax.random.uniform(k3, (M,), dtype=jnp.float32)
    ious = ious.at[0].set(0.9)                                      # at least one kept proposal

    # Case 1: all labels novel — the only case where the torch forward type-checks;
    # compare against the literal line-by-line reference.
    labels_all_novel = jax.random.randint(k2, (M,), NOVEL_MIN, NUM_CLASSES, dtype=jnp.int32)
    out1 = jax.block_until_ready(gcmi_pallas(feats, labels_all_novel, ious))
    ref1 = gcmi_ref_literal(feats, labels_all_novel, ious)
    assert jnp.allclose(out1, ref1, rtol=1e-3, atol=1e-2), (out1, ref1)

    # Case 2: mixed base/novel labels — compare against the masked generalization.
    labels_mixed = jax.random.randint(k4, (M,), 0, NUM_CLASSES, dtype=jnp.int32)
    labels_mixed = labels_mixed.at[0].set(NUM_CLASSES - 1)          # guarantee a novel+kept row
    out2 = jax.block_until_ready(gcmi_pallas(feats, labels_mixed, ious))
    ref2 = gcmi_ref_general(feats, labels_mixed, ious)
    assert jnp.allclose(out2, ref2, rtol=1e-3, atol=1e-2), (out2, ref2)

    print("KERNEL_OK")
</pallas_src>

<mosaic_0001>
module attributes {stable_mosaic.version = 11 : i64} {
  func.func @_gcmi_kernel(%arg0: i32, %arg1: memref<512x128xbf16, #tpu.memory_space<vmem>>, %arg2: memref<128x512xbf16, #tpu.memory_space<vmem>>, %arg3: memref<128x1xbf16, #tpu.memory_space<vmem>>, %arg4: memref<512x1xf32, #tpu.memory_space<vmem>>, %arg5: memref<8x128xf32, #tpu.memory_space<vmem>>) attributes {dimension_semantics = [#tpu.dimension_semantics<parallel>], iteration_bounds = array<i64: 1>, scalar_prefetch = 0 : i64, scratch_operands = 0 : i64, tpu.core_type = #tpu.core_type<tc>, window_params = [{transform_indices = @transform_0, window_bounds = array<i64: 512, 128>}, {pipeline_mode = #tpu.pipeline_mode<synchronous>, transform_indices = @transform_1, window_bounds = array<i64: 128, 512>}, {pipeline_mode = #tpu.pipeline_mode<synchronous>, transform_indices = @transform_2, window_bounds = array<i64: 128, 1>}, {transform_indices = @transform_3, window_bounds = array<i64: 512, 1>}, {transform_indices = @transform_4, window_bounds = array<i64: 8, 128>}]} {
    %c0 = arith.constant 0 : index
    %c0_0 = arith.constant 0 : index
    %0 = vector.load %arg1[%c0, %c0_0] : memref<512x128xbf16, #tpu.memory_space<vmem>>, vector<512x128xbf16>
    %c0_1 = arith.constant 0 : index
    %c0_2 = arith.constant 0 : index
    %1 = vector.load %arg2[%c0_1, %c0_2] : memref<128x512xbf16, #tpu.memory_space<vmem>>, vector<128x512xbf16>
    %cst = arith.constant dense<0.000000e+00> : vector<512x512xf32>
    %2 = tpu.matmul %0, %1, %cst {dimension_numbers = #tpu.dot_dimension_numbers<[1], [0], [0], [1], [0, 0, 1, 1], [], []>} : vector<512x128xbf16>, vector<128x512xbf16>, vector<512x512xf32> -> vector<512x512xf32>
    %cst_3 = arith.constant dense<0xFF800000> : vector<512xf32>
    %3 = vector.multi_reduction <maximumf>, %2, %cst_3 [1] : vector<512x512xf32> to vector<512xf32>
    %4 = vector.shape_cast %3 : vector<512xf32> to vector<512x1xf32>
    %c0_4 = arith.constant 0 : index
    %c0_5 = arith.constant 0 : index
    %5 = vector.load %arg3[%c0_4, %c0_5] : memref<128x1xbf16, #tpu.memory_space<vmem>>, vector<128x1xbf16>
    %cst_6 = arith.constant dense<0.000000e+00> : vector<512x1xf32>
    %6 = tpu.matmul %0, %5, %cst_6 {dimension_numbers = #tpu.dot_dimension_numbers<[1], [0], [0], [1], [0, 0, 1, 1], [], []>} : vector<512x128xbf16>, vector<128x1xbf16>, vector<512x1xf32> -> vector<512x1xf32>
    %c0_7 = arith.constant 0 : index
    %c0_8 = arith.constant 0 : index
    %7 = vector.load %arg4[%c0_7, %c0_8] : memref<512x1xf32, #tpu.memory_space<vmem>>, vector<512x1xf32>
    %cst_9 = arith.constant 5.120000e+02 : f32
    %8 = vector.broadcast %cst_9 : f32 to vector<512x1xf32>
    %9 = arith.mulf %8, %4 : vector<512x1xf32>
    %10 = arith.subf %9, %6 : vector<512x1xf32>
    %11 = arith.mulf %7, %10 : vector<512x1xf32>
    %12 = vector.shape_cast %11 : vector<512x1xf32> to vector<1x512x1xf32>
    %cst_10 = arith.constant dense<0.000000e+00> : vector<1xf32>
    %13 = vector.multi_reduction <add>, %12, %cst_10 [1, 2] : vector<1x512x1xf32> to vector<1xf32>
    %14 = vector.shape_cast %13 : vector<1xf32> to vector<1x1x1xf32>
    %15 = vector.extract %14[0, 0, 0] : f32 from vector<1x1x1xf32>
    %cst_11 = arith.constant 1.000000e+01 : f32
    %16 = arith.mulf %cst_11, %15 : f32
    %17 = vector.broadcast %16 : f32 to vector<8x128xf32>
    %c0_12 = arith.constant 0 : index
    %c0_13 = arith.constant 0 : index
    %18 = vector.load %arg5[%c0_12, %c0_13] : memref<8x128xf32, #tpu.memory_space<vmem>>, vector<8x128xf32>
    tpu.vector_store %arg5[%c0_12, %c0_13], %17 {strides = array<i32>} : memref<8x128xf32, #tpu.memory_space<vmem>>, vector<8x128xf32>,
    return
  }
  func.func @transform_0(%arg0: i32) -> (i32, i32) {
    %c0_i32 = arith.constant 0 : i32
    %c0_i32_0 = arith.constant 0 : i32
    return %arg0, %c0_i32 : i32, i32
  }
  func.func @transform_1(%arg0: i32) -> (i32, i32) {
    %c0_i32 = arith.constant 0 : i32
    %c0_i32_0 = arith.constant 0 : i32
    %c0_i32_1 = arith.constant 0 : i32
    return %c0_i32, %c0_i32_0 : i32, i32
  }
  func.func @transform_2(%arg0: i32) -> (i32, i32) {
    %c0_i32 = arith.constant 0 : i32
    %c0_i32_0 = arith.constant 0 : i32
    %c0_i32_1 = arith.constant 0 : i32
    return %c0_i32, %c0_i32_0 : i32, i32
  }
  func.func @transform_3(%arg0: i32) -> (i32, i32) {
    %c0_i32 = arith.constant 0 : i32
    %c0_i32_0 = arith.constant 0 : i32
    return %arg0, %c0_i32 : i32, i32
  }
  func.func @transform_4(%arg0: i32) -> (i32, i32) {
    %c0_i32 = arith.constant 0 : i32
    %c0_i32_0 = arith.constant 0 : i32
    return %arg0, %c0_i32 : i32, i32
  }
}

</mosaic_0001>

<bundles_post_ra>
// kernel: tpu_custom_call.1
= control target key start
LH: loop header
LB: loop body
LE: loop exit
PB: predicated region body
PF: predicated region fallthrough
CT: control target
= control target key end

     0   :  { %v3901_v2 = vmov 0   ;;  %s3895_s0 = inlined_call_operand.vmem [shape: bf16[512,128], index: 0, kind: input, shape index: {}]   ;;  %s3896_s1 = inlined_call_operand.vmem [shape: bf16[128,512], index: 1, kind: input, shape index: {}]   ;;  %s3897_s2 = inlined_call_operand.vmem [shape: bf16[128,1], index: 2, kind: input, shape index: {}]   ;;  %s3898_s3 = inlined_call_operand.vmem [shape: f32[512,1], index: 3, kind: input, shape index: {}]   ;;  %s3899_s4 = inlined_call_operand.hbm [shape: f32[8,128], index: 4, kind: output, shape index: {}]  }
   0x1   :  { %v2468_v0 = vld [vmem:[%s3896_s1 + $0xe4] ss:$16 sps:$4 sm:$0xff]   ;;  %v2470_v1 = vld [vmem:[%s3896_s1 + $0xe0] ss:$16 sps:$4 sm:$0xff]   ;;  %739 = vmatprep.mubr.bf16.mxu1 %v3901_v2  ;;  %499 = vmatprep.mubr.bf16.mxu0 %v3901_v2  ;;  %v2495_v17 = vld [vmem:[%s3896_s1 + $0xec] ss:$16 sps:$4 sm:$0xff]  }
   0x2   :  { %2448 = vmatprep.subr.bf16.mxu1 %v2468_v0  ;;  %v2471_v3 = vld [vmem:[%s3896_s1 + $0xc4] ss:$16 sps:$4 sm:$0xff]   ;;  %467 = vmatprep.subr.bf16.mxu0 %v2468_v0  ;;  %v2473_v4 = vld [vmem:[%s3896_s1 + $0xc0] ss:$16 sps:$4 sm:$0xff]   ;;  %v2493_v20 = vld [vmem:[%s3896_s1 + $0xe8] ss:$16 sps:$4 sm:$0xff]  }
   0x3   :  { %2456 = vmatpush1.bf16.msra.mxu1 %v2470_v1  ;;  %468 = vmatpush1.bf16.msra.mxu0 %v2470_v1  ;;  %v2474_v5 = vld [vmem:[%s3896_s1 + $0xa4] ss:$16 sps:$4 sm:$0xff]   ;;  %v2476_v6 = vld [vmem:[%s3896_s1 + $0xa0] ss:$16 sps:$4 sm:$0xff]   ;;  %v2499_v21 = vld [vmem:[%s3896_s1 + $0xcc] ss:$16 sps:$4 sm:$0xff]  }
   0x4   :  { %2449 = vmatprep.subr.bf16.mxu1 %v2471_v3  ;;  %469 = vmatprep.subr.bf16.mxu0 %v2471_v3  ;;  %v2477_v7 = vld [vmem:[%s3896_s1 + $0x84] ss:$16 sps:$4 sm:$0xff]   ;;  %v2479_v8 = vld [vmem:[%s3896_s1 + $0x80] ss:$16 sps:$4 sm:$0xff]   ;;  %v2497_v22 = vld [vmem:[%s3896_s1 + $0xc8] ss:$16 sps:$4 sm:$0xff]  }
   0x5   :  { %v2480_v9 = vld [vmem:[%s3896_s1 + $0x64] ss:$16 sps:$4 sm:$0xff]   ;;  %v2482_v10 = vld [vmem:[%s3896_s1 + $0x60] ss:$16 sps:$4 sm:$0xff]   ;;  %v2504_v23 = vld [vmem:[%s3896_s1 + $0xac] ss:$16 sps:$4 sm:$0xff]  }
   0x6   :  { %v2483_v11 = vld [vmem:[%s3896_s1 + $0x44] ss:$16 sps:$4 sm:$0xff]   ;;  %v2485_v12 = vld [vmem:[%s3896_s1 + $0x40] ss:$16 sps:$4 sm:$0xff]   ;;  %v2687_v24 = vld [vmem:[%s3895_s0 + $0xc8] sm:$0xff]  }
   0x7   :  { %2457 = vmatpush1.bf16.msra.mxu1 %v2473_v4  ;;  %470 = vmatpush1.bf16.msra.mxu0 %v2473_v4  ;;  %v2486_v13 = vld [vmem:[%s3896_s1 + $0x24] ss:$16 sps:$4 sm:$0xff]   ;;  %v2488_v14 = vld [vmem:[%s3896_s1 + $0x20] ss:$16 sps:$4 sm:$0xff]   ;;  %v2692_v25 = vld [vmem:[%s3895_s0 + $0x8] sm:$0xff]  }
   0x8   :  { %2450 = vmatprep.subr.bf16.mxu1 %v2474_v5  ;;  %471 = vmatprep.subr.bf16.mxu0 %v2474_v5  ;;  %v2489_v15 = vld [vmem:[%s3896_s1 + $0x4] ss:$16 sps:$4 sm:$0xff]   ;;  %v2491_v16 = vld [vmem:[%s3896_s1] ss:$16 sps:$4 sm:$0xff]   ;;  %v2502_v26 = vld [vmem:[%s3896_s1 + $0xa8] ss:$16 sps:$4 sm:$0xff]  }
   0x9   :  { %v2661_v18 = vld [vmem:[%s3895_s0 + $0xc0] sm:$0xff]   ;;  %v2509_v27 = vld [vmem:[%s3896_s1 + $0x8c] ss:$16 sps:$4 sm:$0xff]   ;;  %v2507_v28 = vld [vmem:[%s3896_s1 + $0x88] ss:$16 sps:$4 sm:$0xff]  }
   0xa   :  { %v2666_v19 = vld [vmem:[%s3895_s0] sm:$0xff]   ;;  %v2709_v29 = vld [vmem:[%s3895_s0 + $0xd0] sm:$0xff]   ;;  %v2514_v31 = vld [vmem:[%s3896_s1 + $0x6c] ss:$16 sps:$4 sm:$0xff]  }
   0xb   :  { %2458 = vmatpush1.bf16.msra.mxu1 %v2476_v6  ;;  %472 = vmatpush1.bf16.msra.mxu0 %v2476_v6  ;;  %v2715_v30 = vld [vmem:[%s3895_s0 + $0x10] sm:$0xff]   ;;  %v2512_v32 = vld [vmem:[%s3896_s1 + $0x68] ss:$16 sps:$4 sm:$0xff]   ;;  %v2519_v34 = vld [vmem:[%s3896_s1 + $0x4c] ss:$16 sps:$4 sm:$0xff]  }
   0xc   :  { %2451 = vmatprep.subr.bf16.mxu1 %v2477_v7  ;;  %473 = vmatprep.subr.bf16.mxu0 %v2477_v7  ;;  %v2540_v33 = vld [vmem:[%s3897_s2 + $0x38] sm:$0xff]  }
   0xd   :  { %v2517_v35 = vld [vmem:[%s3896_s1 + $0x48] ss:$16 sps:$4 sm:$0xff]   ;;  %v2524_v36 = vld [vmem:[%s3896_s1 + $0x2c] ss:$16 sps:$4 sm:$0xff]  }
   0xe   :  { %v2741_v37 = vld [vmem:[%s3895_s0 + $0xd8] sm:$0xff]  }
   0xf   :  { %2459 = vmatpush1.bf16.msra.mxu1 %v2479_v8  ;;  %474 = vmatpush1.bf16.msra.mxu0 %v2479_v8  ;;  %v2747_v38 = vld [vmem:[%s3895_s0 + $0x18] sm:$0xff]  }
  0x10   :  { %2452 = vmatprep.subr.bf16.mxu1 %v2480_v9  ;;  %475 = vmatprep.subr.bf16.mxu0 %v2480_v9  ;;  %v2522_v39 = vld [vmem:[%s3896_s1 + $0x28] ss:$16 sps:$4 sm:$0xff]   ;;  %v2529_v40 = vld [vmem:[%s3896_s1 + $0xc] ss:$16 sps:$4 sm:$0xff]  }
  0x13   :  { %2460 = vmatpush1.bf16.msra.mxu1 %v2482_v10  ;;  %476 = vmatpush1.bf16.msra.mxu0 %v2482_v10 }
  0x14   :  { %2453 = vmatprep.subr.bf16.mxu1 %v2483_v11  ;;  %477 = vmatprep.subr.bf16.mxu0 %v2483_v11 }
  0x17   :  { %2461 = vmatpush1.bf16.msra.mxu1 %v2485_v12  ;;  %478 = vmatpush1.bf16.msra.mxu0 %v2485_v12 }
  0x18   :  { %2454 = vmatprep.subr.bf16.mxu1 %v2486_v13  ;;  %479 = vmatprep.subr.bf16.mxu0 %v2486_v13 }
  0x1b   :  { %2462 = vmatpush1.bf16.msra.mxu1 %v2488_v14  ;;  %480 = vmatpush1.bf16.msra.mxu0 %v2488_v14 }
  0x1c   :  { %2455 = vmatprep.subr.bf16.mxu1 %v2489_v15  ;;  %481 = vmatprep.subr.bf16.mxu0 %v2489_v15 }
  0x1f   :  { %2463 = vmatpush1.bf16.msra.mxu1 %v2491_v16  ;;  %482 = vmatpush1.bf16.msra.mxu0 %v2491_v16 }
  0x20   :  { %820 = vmatprep.subr.bf16.mxu1 %v2495_v17  ;;  %2368 = vmatprep.subr.bf16.mxu0 %v2540_v33 }
  0x22   :  { %740 = vmatmul.mubr.bf16.vlgmr.msra.gmra.mxu1 %v2661_v18  ;;  %500 = vmatmul.mubr.bf16.vlgmr.msra.gmra.mxu0 %v2666_v19 }
  0x23   :  { %821 = vmatpush1.bf16.msra.mxu1 %v2493_v20  ;;  %749 = vmatprep.mubr.bf16.mxu1 %v3901_v2 }
  0x24   :  { %822 = vmatprep.subr.bf16.mxu1 %v2499_v21  ;;  %509 = vmatprep.mubr.bf16.mxu0 %v3901_v2 }
  0x25   :  { %2369 = vmatpush3.bf16.msra.mxu0 %v2540_v33 }
  0x27   :  { %823 = vmatpush1.bf16.msra.mxu1 %v2497_v22 }
  0x28   :  { %824 = vmatprep.subr.bf16.mxu1 %v2504_v23 }
  0x2a   :  { %750 = vmatmul.mubr.bf16.gmra.mxu1 %v2687_v24  ;;  %510 = vmatmul.mubr.bf16.gmra.mxu0 %v2692_v25 }
  0x2b   :  { %759 = vmatprep.mubr.bf16.mxu1 %v3901_v2  ;;  %825 = vmatpush1.bf16.msra.mxu1 %v2502_v26 }
  0x2c   :  { %826 = vmatprep.subr.bf16.mxu1 %v2509_v27  ;;  %519 = vmatprep.mubr.bf16.mxu0 %v3901_v2 }
  0x2f   :  { %827 = vmatpush1.bf16.msra.mxu1 %v2507_v28 }
  0x30   :  { %828 = vmatprep.subr.bf16.mxu1 %v2514_v31 }
  0x32   :  { %760 = vmatmul.mubr.bf16.gmra.mxu1 %v2709_v29  ;;  %520 = vmatmul.mubr.bf16.gmra.mxu0 %v2715_v30 }
  0x33   :  { %769 = vmatprep.mubr.bf16.mxu1 %v3901_v2  ;;  %829 = vmatpush1.bf16.msra.mxu1 %v2512_v32 }
  0x34   :  { %529 = vmatprep.mubr.bf16.mxu0 %v3901_v2  ;;  %830 = vmatprep.subr.bf16.mxu1 %v2519_v34 }
  0x37   :  { %831 = vmatpush1.bf16.msra.mxu1 %v2517_v35 }
  0x38   :  { %832 = vmatprep.subr.bf16.mxu1 %v2524_v36 }
  0x39   :  { %9 = vsyncpa [#allocation3], 0  ;;  %v2527_v41 = vld [vmem:[%s3896_s1 + $0x8] ss:$16 sps:$4 sm:$0xff]   ;;  %v2765_v42 = vld [vmem:[%s3895_s0 + $0xe0] sm:$0xff]   ;;  %v3945_v26 = vmov 0  }
  0x3a   :  { %770 = vmatmul.mubr.bf16.gmra.mxu1 %v2741_v37  ;;  %530 = vmatmul.mubr.bf16.gmra.mxu0 %v2747_v38  ;;  %v2770_v43 = vld [vmem:[%s3895_s0 + $0x20] sm:$0xff]   ;;  %v2544_v44 = vld [vmem:[%s3897_s2 + $0x30] sm:$0xff]   ;;  %v2782_v45 = vld [vmem:[%s3895_s0 + $0xe8] sm:$0xff]   ;;  %vm2102_vm0 = vcmask 7168   ;;  %s2579_s9 = smov [#allocation2]  }
  0x3b   :  { %779 = vmatprep.mubr.bf16.mxu1 %v3901_v2  ;;  %539 = vmatprep.mubr.bf16.mxu0 %v3901_v2  ;;  %v2787_v46 = vld [vmem:[%s3895_s0 + $0x28] sm:$0xff]   ;;  %v2796_v47 = vld [vmem:[%s3895_s0 + $0xf0] sm:$0xff]   ;;  %v2813_v50 = vld [vmem:[%s3895_s0 + $0xf8] sm:$0xff]  }
  0x3c   :  { %833 = vmatpush1.bf16.msra.mxu1 %v2522_v39  ;;  %2370 = vmatprep.subr.bf16.mxu0 %v2544_v44  ;;  %v2801_v48 = vld [vmem:[%s3895_s0 + $0x30] sm:$0xff]   ;;  %v2548_v49 = vld [vmem:[%s3897_s2 + $0x28] sm:$0xff]   ;;  %v2818_v51 = vld [vmem:[%s3895_s0 + $0x38] sm:$0xff]  }
  0x3d   :  { %834 = vmatprep.subr.bf16.mxu1 %v2529_v40  ;;  %2371 = vmatpush3.bf16.msra.mxu0 %v2544_v44  ;;  %v2549_v52 = vld [vmem:[%s3897_s2 + $0x20] sm:$0xff]   ;;  %v2551_v53 = vld [vmem:[%s3897_s2 + $0x18] sm:$0xff]   ;;  %v2552_v55 = vld [vmem:[%s3897_s2 + $0x10] sm:$0xff]  }
  0x3e   :  { %2372 = vmatprep.subr.bf16.mxu0 %v2548_v49  ;;  %v2833_v54 = vld [vmem:[%s3895_s0 + $0x40] sm:$0xff]   ;;  %v2845_v56 = vld [vmem:[%s3895_s0 + $0x48] sm:$0xff]   ;;  %v2860_v59 = vld [vmem:[%s3895_s0 + $0x50] sm:$0xff]  }
  0x3f   :  { %v2554_v57 = vld [vmem:[%s3897_s2 + $0x8] sm:$0xff]   ;;  %v2555_v58 = vld [vmem:[%s3897_s2] sm:$0xff]   ;;  %v2869_v60 = vld [vmem:[%s3895_s0 + $0x58] sm:$0xff]  }
  0x40   :  { %835 = vmatpush1.bf16.msra.mxu1 %v2527_v41  ;;  %v2878_v61 = vld [vmem:[%s3895_s0 + $0x60] sm:$0xff]   ;;  %v2887_v62 = vld [vmem:[%s3895_s0 + $0x68] sm:$0xff]   ;;  %v2896_v63 = vld [vmem:[%s3895_s0 + $0x70] sm:$0xff]  }
  0x41   :  { %2373 = vmatpush3.bf16.msra.mxu0 %v2548_v49  ;;  %v2905_v0 = vld [vmem:[%s3895_s0 + $0x78] sm:$0xff]   ;;  %v2914_v1 = vld [vmem:[%s3895_s0 + $0x80] sm:$0xff]   ;;  %v2923_v3 = vld [vmem:[%s3895_s0 + $0x88] sm:$0xff]  }
  0x42   :  { %780 = vmatmul.mubr.bf16.gmra.mxu1 %v2765_v42  ;;  %540 = vmatmul.mubr.bf16.gmra.mxu0 %v2770_v43  ;;  %v2932_v4 = vld [vmem:[%s3895_s0 + $0x90] sm:$0xff]   ;;  %v2941_v5 = vld [vmem:[%s3895_s0 + $0x98] sm:$0xff]   ;;  %v2950_v6 = vld [vmem:[%s3895_s0 + $0xa0] sm:$0xff]  }
  0x43   :  { %789 = vmatprep.mubr.bf16.mxu1 %v3901_v2  ;;  %549 = vmatprep.mubr.bf16.mxu0 %v3901_v2  ;;  %v2959_v7 = vld [vmem:[%s3895_s0 + $0xa8] sm:$0xff]   ;;  %v2968_v8 = vld [vmem:[%s3895_s0 + $0xb0] sm:$0xff]   ;;  %v2977_v9 = vld [vmem:[%s3895_s0 + $0xb8] sm:$0xff]  }
  0x44   :  { %2374 = vmatprep.subr.bf16.mxu0 %v2549_v52 }
  0x45   :  { %2375 = vmatpush3.bf16.msra.mxu0 %v2549_v52 }
  0x46   :  { %2376 = vmatprep.subr.bf16.mxu0 %v2551_v53 }
  0x49   :  { %2377 = vmatpush3.bf16.msra.mxu0 %v2551_v53 }
  0x4a   :  { %790 = vmatmul.mubr.bf16.gmra.mxu1 %v2782_v45  ;;  %550 = vmatmul.mubr.bf16.gmra.mxu0 %v2787_v46 }
  0x4b   :  { %799 = vmatprep.mubr.bf16.mxu1 %v3901_v2  ;;  %559 = vmatprep.mubr.bf16.mxu0 %v3901_v2 }
  0x4c   :  { %2378 = vmatprep.subr.bf16.mxu0 %v2552_v55 }
  0x4d   :  { %2379 = vmatpush3.bf16.msra.mxu0 %v2552_v55 }
  0x4e   :  { %2380 = vmatprep.subr.bf16.mxu0 %v2554_v57 }
  0x51   :  { %2381 = vmatpush3.bf16.msra.mxu0 %v2554_v57 }
  0x52   :  { %800 = vmatmul.mubr.bf16.gmra.mxu1 %v2796_v47  ;;  %560 = vmatmul.mubr.bf16.gmra.mxu0 %v2801_v48 }
  0x53   :  { %809 = vmatprep.mubr.bf16.mxu1 %v3901_v2  ;;  %569 = vmatprep.mubr.bf16.mxu0 %v3901_v2 }
  0x54   :  { %2382 = vmatprep.subr.bf16.mxu0 %v2555_v58 }
  0x55   :  { %2383 = vmatpush3.bf16.msra.mxu0 %v2555_v58 }
  0x5a   :  { %810 = vmatmul.mubr.bf16.gmra.mxu1 %v2813_v50  ;;  %570 = vmatmul.mubr.bf16.gmra.mxu0 %v2818_v51 }
  0x5b   :  { %852 = vmatprep.mubr.bf16.mxu1 %v3901_v2  ;;  %579 = vmatprep.mubr.bf16.mxu0 %v3901_v2 }
  0x62   :  { %853 = vmatmul.mubr.bf16.vlgmr.msra.gmra.mxu1 %v2666_v19  ;;  %580 = vmatmul.mubr.bf16.gmra.mxu0 %v2833_v54 }
  0x63   :  { %862 = vmatprep.mubr.bf16.mxu1 %v3901_v2  ;;  %589 = vmatprep.mubr.bf16.mxu0 %v3901_v2 }
  0x6a   :  { %863 = vmatmul.mubr.bf16.gmra.mxu1 %v2692_v25  ;;  %590 = vmatmul.mubr.bf16.gmra.mxu0 %v2845_v56 }
  0x6b   :  { %872 = vmatprep.mubr.bf16.mxu1 %v3901_v2  ;;  %599 = vmatprep.mubr.bf16.mxu0 %v3901_v2 }
  0x72   :  { %873 = vmatmul.mubr.bf16.gmra.mxu1 %v2715_v30  ;;  %600 = vmatmul.mubr.bf16.gmra.mxu0 %v2860_v59 }
  0x73   :  { %882 = vmatprep.mubr.bf16.mxu1 %v3901_v2  ;;  %609 = vmatprep.mubr.bf16.mxu0 %v3901_v2 }
  0x7a   :  { %883 = vmatmul.mubr.bf16.gmra.mxu1 %v2747_v38  ;;  %610 = vmatmul.mubr.bf16.gmra.mxu0 %v2869_v60 }
  0x7b   :  { %892 = vmatprep.mubr.bf16.mxu1 %v3901_v2  ;;  %619 = vmatprep.mubr.bf16.mxu0 %v3901_v2 }
  0x82   :  { %893 = vmatmul.mubr.bf16.gmra.mxu1 %v2770_v43  ;;  %620 = vmatmul.mubr.bf16.gmra.mxu0 %v2878_v61 }
  0x83   :  { %902 = vmatprep.mubr.bf16.mxu1 %v3901_v2  ;;  %629 = vmatprep.mubr.bf16.mxu0 %v3901_v2 }
  0x8a   :  { %903 = vmatmul.mubr.bf16.gmra.mxu1 %v2787_v46  ;;  %630 = vmatmul.mubr.bf16.gmra.mxu0 %v2887_v62 }
  0x8b   :  { %912 = vmatprep.mubr.bf16.mxu1 %v3901_v2  ;;  %639 = vmatprep.mubr.bf16.mxu0 %v3901_v2 }
  0x92   :  { %913 = vmatmul.mubr.bf16.gmra.mxu1 %v2801_v48  ;;  %640 = vmatmul.mubr.bf16.gmra.mxu0 %v2896_v63 }
  0x93   :  { %922 = vmatprep.mubr.bf16.mxu1 %v3901_v2  ;;  %649 = vmatprep.mubr.bf16.mxu0 %v3901_v2 }
  0x9a   :  { %923 = vmatmul.mubr.bf16.gmra.mxu1 %v2818_v51  ;;  %650 = vmatmul.mubr.bf16.gmra.mxu0 %v2905_v0 }
  0x9b   :  { %932 = vmatprep.mubr.bf16.mxu1 %v3901_v2  ;;  %659 = vmatprep.mubr.bf16.mxu0 %v3901_v2 }
  0xa2   :  { %933 = vmatmul.mubr.bf16.gmra.mxu1 %v2833_v54  ;;  %660 = vmatmul.mubr.bf16.gmra.mxu0 %v2914_v1 }
  0xa3   :  { %942 = vmatprep.mubr.bf16.mxu1 %v3901_v2  ;;  %669 = vmatprep.mubr.bf16.mxu0 %v3901_v2 }
  0xaa   :  { %943 = vmatmul.mubr.bf16.gmra.mxu1 %v2845_v56  ;;  %670 = vmatmul.mubr.bf16.gmra.mxu0 %v2923_v3 }
  0xab   :  { %952 = vmatprep.mubr.bf16.mxu1 %v3901_v2  ;;  %679 = vmatprep.mubr.bf16.mxu0 %v3901_v2 }
  0xb2   :  { %953 = vmatmul.mubr.bf16.gmra.mxu1 %v2860_v59  ;;  %680 = vmatmul.mubr.bf16.gmra.mxu0 %v2932_v4 }
  0xb3   :  { %962 = vmatprep.mubr.bf16.mxu1 %v3901_v2  ;;  %689 = vmatprep.mubr.bf16.mxu0 %v3901_v2 }
  0xba   :  { %963 = vmatmul.mubr.bf16.gmra.mxu1 %v2869_v60  ;;  %690 = vmatmul.mubr.bf16.gmra.mxu0 %v2941_v5 }
  0xbb   :  { %972 = vmatprep.mubr.bf16.mxu1 %v3901_v2  ;;  %699 = vmatprep.mubr.bf16.mxu0 %v3901_v2 }
  0xc2   :  { %973 = vmatmul.mubr.bf16.gmra.mxu1 %v2878_v61  ;;  %700 = vmatmul.mubr.bf16.gmra.mxu0 %v2950_v6 }
  0xc3   :  { %982 = vmatprep.mubr.bf16.mxu1 %v3901_v2  ;;  %709 = vmatprep.mubr.bf16.mxu0 %v3901_v2 }
  0xca   :  { %983 = vmatmul.mubr.bf16.gmra.mxu1 %v2887_v62  ;;  %710 = vmatmul.mubr.bf16.gmra.mxu0 %v2959_v7 }
  0xcb   :  { %992 = vmatprep.mubr.bf16.mxu1 %v3901_v2  ;;  %719 = vmatprep.mubr.bf16.mxu0 %v3901_v2 }
  0xd2   :  { %993 = vmatmul.mubr.bf16.gmra.mxu1 %v2896_v63  ;;  %720 = vmatmul.mubr.bf16.gmra.mxu0 %v2968_v8 }
  0xd3   :  { %1002 = vmatprep.mubr.bf16.mxu1 %v3901_v2  ;;  %729 = vmatprep.mubr.bf16.mxu0 %v3901_v2 }
  0xda   :  { %1003 = vmatmul.mubr.bf16.gmra.mxu1 %v2905_v0  ;;  %730 = vmatmul.mubr.bf16.gmra.mxu0 %v2977_v9 }
  0xdb   :  { %1012 = vmatprep.mubr.bf16.mxu1 %v3901_v2  ;;  %2384 = vmatprep.mubr.bf16.mxu0 %v2666_v19 }
  0xe2   :  { %v2983_v10 = vpop.f32.mrf.mxu1  ;;  %1013 = vmatmul.mubr.bf16.gmra.mxu1 %v2914_v1  ;;  %v2986_v11 = vpop.f32.mrf.mxu0  ;;  %2385 = vmatmul.mubr.bf16.vlgmr.msra.gmra.mxu0 %v2692_v25 }
  0xe3   :  { %1022 = vmatprep.mubr.bf16.mxu1 %v3901_v2  ;;  %2388 = vmatprep.mubr.bf16.mxu0 %v2715_v30 }
  0xe4   :  { %v2991_v12 = vpop.f32.mrf.mxu1  ;;  %v2993_v13 = vpop.f32.mrf.mxu0 }
  0xe6   :  { %v2997_v15 = vpop.f32.mrf.mxu1  ;;  %v2999_v16 = vpop.f32.mrf.mxu0 }
  0xe8   :  { %v3001_v17 = vpop.f32.mrf.mxu1  ;;  %v3003_v19 = vpop.f32.mrf.mxu0 }
  0xea   :  { %v3007_v21 = vpop.f32.mrf.mxu1  ;;  %1023 = vmatmul.mubr.bf16.gmra.mxu1 %v2923_v3  ;;  %v3010_v22 = vpop.f32.mrf.mxu0  ;;  %2389 = vmatmul.mubr.bf16.gmra.mxu0 %v2747_v38 }
  0xeb   :  { %1032 = vmatprep.mubr.bf16.mxu1 %v3901_v2  ;;  %2392 = vmatprep.mubr.bf16.mxu0 %v2770_v43 }
  0xec   :  { %v3015_v23 = vpop.f32.mrf.mxu1  ;;  %v3017_v25 = vpop.f32.mrf.mxu0 }
  0xed   :  { %3929 = vst [vmem:[#allocation5_spill] sm:$0xff] %v3015_v23 }
  0xee   :  { %v3021_v27 = vpop.f32.mrf.mxu1  ;;  %v3023_v28 = vpop.f32.mrf.mxu0 }
  0xef   :  { %3930 = vst [vmem:[#allocation6_spill] sm:$0xff] %v3021_v27 }
  0xf0   :  { %v3025_v30 = vpop.f32.mrf.mxu1  ;;  %v3027_v31 = vpop.f32.mrf.mxu0 }
  0xf1   :  { %3931 = vst [vmem:[#allocation7_spill] sm:$0xff] %v3025_v30 }
  0xf2   :  { %v3031_v33 = vpop.f32.mrf.mxu1  ;;  %1033 = vmatmul.mubr.bf16.gmra.mxu1 %v2932_v4  ;;  %v3034_v34 = vpop.f32.mrf.mxu0  ;;  %2393 = vmatmul.mubr.bf16.gmra.mxu0 %v2787_v46 }
  0xf3   :  { %3932 = vst [vmem:[#allocation8_spill] sm:$0xff] %v3031_v33  ;;  %1042 = vmatprep.mubr.bf16.mxu1 %v3901_v2  ;;  %2396 = vmatprep.mubr.bf16.mxu0 %v2801_v48 }
  0xf4   :  { %v3039_v35 = vpop.f32.mrf.mxu1  ;;  %v3041_v36 = vpop.f32.mrf.mxu0 }
  0xf5   :  { %3933 = vst [vmem:[#allocation9_spill] sm:$0xff] %v3039_v35 }
  0xf6   :  { %v3045_v39 = vpop.f32.mrf.mxu1  ;;  %v3047_v40 = vpop.f32.mrf.mxu0 }
  0xf7   :  { %3934 = vst [vmem:[#allocation10_spill] sm:$0xff] %v3045_v39 }
  0xf8   :  { %v3049_v41 = vpop.f32.mrf.mxu1  ;;  %v3051_v43 = vpop.f32.mrf.mxu0 }
  0xf9   :  { %3935 = vst [vmem:[#allocation11_spill] sm:$0xff] %v3049_v41 }
  0xfa   :  { %v3055_v46 = vpop.f32.mrf.mxu1  ;;  %1043 = vmatmul.mubr.bf16.gmra.mxu1 %v2941_v5  ;;  %v3058_v48 = vpop.f32.mrf.mxu0  ;;  %2397 = vmatmul.mubr.bf16.gmra.mxu0 %v2818_v51 }
  0xfb   :  { %3936 = vst [vmem:[#allocation12_spill] sm:$0xff] %v3055_v46  ;;  %1052 = vmatprep.mubr.bf16.mxu1 %v3901_v2  ;;  %2400 = vmatprep.mubr.bf16.mxu0 %v2833_v54 }
  0xfc   :  { %v3063_v49 = vpop.f32.mrf.mxu1  ;;  %v3065_v52 = vpop.f32.mrf.mxu0 }
  0xfd   :  { %3937 = vst [vmem:[#allocation13_spill] sm:$0xff] %v3063_v49 }
  0xfe   :  { %v3069_v55 = vpop.f32.mrf.mxu1  ;;  %v3071_v57 = vpop.f32.mrf.mxu0 }
  0xff   :  { %3938 = vst [vmem:[#allocation14_spill] sm:$0xff] %v3069_v55 }
 0x100   :  { %v3073_v58 = vpop.f32.mrf.mxu1  ;;  %v3075_v44 = vpop.f32.mrf.mxu0 }
 0x101   :  { %3939 = vst [vmem:[#allocation15_spill] sm:$0xff] %v3073_v58 }
 0x102   :  { %v3079_v38 = vpop.f32.mrf.mxu1  ;;  %1053 = vmatmul.mubr.bf16.gmra.mxu1 %v2950_v6  ;;  %v3082_v54 = vpop.f32.mrf.mxu0  ;;  %2401 = vmatmul.mubr.bf16.gmra.mxu0 %v2845_v56 }
 0x103   :  { %3940 = vst [vmem:[#allocation16_spill] sm:$0xff] %v3079_v38  ;;  %1062 = vmatprep.mubr.bf16.mxu1 %v3901_v2  ;;  %2404 = vmatprep.mubr.bf16.mxu0 %v2860_v59 }
 0x104   :  { %v3087_v53 = vpop.f32.mrf.mxu1  ;;  %v3089_v32 = vpop.f32.mrf.mxu0 }
 0x105   :  { %3941 = vst [vmem:[#allocation17_spill] sm:$0xff] %v3087_v53 }
 0x106   :  { %v3093_v51 = vpop.f32.mrf.mxu1  ;;  %v3095_v20 = vpop.f32.mrf.mxu0 }
 0x107   :  { %3942 = vst [vmem:[#allocation18_spill] sm:$0xff] %v3093_v51 }
 0x108   :  { %v3097_v14 = vpop.f32.mrf.mxu1  ;;  %v3099_v58 = vpop.f32.mrf.mxu0 }
 0x109   :  { %3943 = vst [vmem:[#allocation19_spill] sm:$0xff] %v3097_v14 }
 0x10a   :  { %v3103_v2 = vpop.f32.mrf.mxu1  ;;  %1063 = vmatmul.mubr.bf16.gmra.mxu1 %v2959_v7  ;;  %v3106_v59 = vpop.f32.mrf.mxu0  ;;  %2405 = vmatmul.mubr.bf16.gmra.mxu0 %v2869_v60 }
 0x10b   :  { %3944 = vst [vmem:[#allocation20_spill] sm:$0xff] %v3103_v2  ;;  %1072 = vmatprep.mubr.bf16.mxu1 %v3945_v26  ;;  %2408 = vmatprep.mubr.bf16.mxu0 %v2878_v61 }
 0x10c   :  { %v3111_v53 = vpop.f32.mrf.mxu1  ;;  %v3113_v38 = vpop.f32.mrf.mxu0 }
 0x10d   :  { %3946 = vst [vmem:[#allocation21_spill] sm:$0xff] %v3111_v53 }
 0x10e   :  { %v3117_v56 = vpop.f32.mrf.mxu1  ;;  %v3119_v14 = vpop.f32.mrf.mxu0 }
 0x10f   :  { %3947 = vst [vmem:[#allocation22_spill] sm:$0xff] %v3117_v56 }
 0x110   :  { %v3121_v51 = vpop.f32.mrf.mxu1  ;;  %v3123_v49 = vpop.f32.mrf.mxu0 }
 0x111   :  { %3948 = vst [vmem:[#allocation23_spill] sm:$0xff] %v3121_v51 }
 0x112   :  { %v3127_v46 = vpop.f32.mrf.mxu1  ;;  %1073 = vmatmul.mubr.bf16.gmra.mxu1 %v2968_v8  ;;  %v3130_v61 = vpop.f32.mrf.mxu0  ;;  %2409 = vmatmul.mubr.bf16.gmra.mxu0 %v2887_v62 }
 0x113   :  { %3949 = vst [vmem:[#allocation24_spill] sm:$0xff] %v3127_v46  ;;  %1082 = vmatprep.mubr.bf16.mxu1 %v3945_v26  ;;  %2412 = vmatprep.mubr.bf16.mxu0 %v2896_v63  ;;  %v1178_v46 = vmax.f32 %v2999_v16, %v3003_v19 }
 0x114   :  { %v3135_v55 = vpop.f32.mrf.mxu1  ;;  %v3137_v53 = vpop.f32.mrf.mxu0 }
 0x115   :  { %3950 = vst [vmem:[#allocation25_spill] sm:$0xff] %v3135_v55 }
 0x116   :  { %v3141_v60 = vpop.f32.mrf.mxu1  ;;  %v3143_v51 = vpop.f32.mrf.mxu0 }
 0x117   :  { %3951 = vst [vmem:[#allocation26_spill] sm:$0xff] %v3141_v60  ;;  %v1173_v60 = vmax.f32 %v2986_v11, %v2993_v13 }
 0x118   :  { %v3145_v56 = vpop.f32.mrf.mxu1  ;;  %v3147_v41 = vpop.f32.mrf.mxu0 }
 0x119   :  { %3952 = vst [vmem:[#allocation27_spill] sm:$0xff] %v3145_v56 }
 0x11a   :  { %v3151_v39 = vpop.f32.mrf.mxu1  ;;  %1083 = vmatmul.mubr.bf16.gmra.mxu1 %v2977_v9  ;;  %v3154_v63 = vpop.f32.mrf.mxu0  ;;  %2413 = vmatmul.mubr.bf16.gmra.mxu0 %v2905_v0 }
 0x11b   :  { %3953 = vst [vmem:[#allocation28_spill] sm:$0xff] %v3151_v39  ;;  %1092 = vmatprep.mubr.bf16.mxu1 %v3945_v26  ;;  %2416 = vmatprep.mubr.bf16.mxu0 %v2914_v1 }
 0x11c   :  { %v3159_v2 = vpop.f32.mrf.mxu1  ;;  %v3161_v55 = vpop.f32.mrf.mxu0 }
 0x11d   :  { %3954 = vst [vmem:[#allocation29_spill] sm:$0xff] %v3159_v2 }
 0x11e   :  { %v3165_v62 = vpop.f32.mrf.mxu1  ;;  %v3167_v56 = vpop.f32.mrf.mxu0 }
 0x11f   :  { %3955 = vst [vmem:[#allocation30_spill] sm:$0xff] %v3165_v62  ;;  %v1183_v62 = vmax.f32 %v3010_v22, %v3017_v25 }
 0x120   :  { %v3171_v35 = vpop.f32.mrf.mxu1  ;;  %v3173_v0 = vpop.f32.mrf.mxu0 }
 0x121   :  { %3956 = vst [vmem:[#allocation31_spill] sm:$0xff] %v3171_v35 }
 0x122   :  { %v854_v33 = vpop.f32.mrf.mxu1  ;;  %1093 = vmatmul.mubr.bf16.gmra.mxu1 %v2661_v18  ;;  %v3178_v30 = vpop.f32.mrf.mxu0  ;;  %2417 = vmatmul.mubr.bf16.gmra.mxu0 %v2923_v3 }
 0x123   :  { %v1174_v2 = vmax.f32 %v1173_v60, %v854_v33  ;;  %1102 = vmatprep.mubr.bf16.mxu1 %v3945_v26  ;;  %2420 = vmatprep.mubr.bf16.mxu0 %v2932_v4  ;;  %v1193_v60 = vmax.f32 %v3034_v34, %v3041_v36 }
 0x124   :  { %v856_v11 = vpop.f32.mrf.mxu1  ;;  %v3185_v13 = vpop.f32.mrf.mxu0 }
 0x125   :  { %v1175_v39 = vmax.f32 %v1174_v2, %v856_v11  ;;  %v1188_v2 = vmax.f32 %v3023_v28, %v3027_v31 }
 0x126   :  { %v858_v1 = vpop.f32.mrf.mxu1  ;;  %v3187_v35 = vpop.f32.mrf.mxu0 }
 0x127   :  { %v1179_v27 = vmax.f32 %v1178_v46, %v858_v1  ;;  %1176 = vmax.xlane.f32.xlu0 %v1175_v39 }
 0x128   :  { %v860_v3 = vpop.f32.mrf.mxu1  ;;  %v3191_v23 = vpop.f32.mrf.mxu0 }
 0x129   :  { %v1180_v16 = vmax.f32 %v1179_v27, %v860_v3 }
 0x12a   :  { %v864_v19 = vpop.f32.mrf.mxu1  ;;  %1103 = vmatmul.mubr.bf16.gmra.mxu1 %v2687_v24  ;;  %v3194_v4 = vpop.f32.mrf.mxu0  ;;  %2421 = vmatmul.mubr.bf16.gmra.mxu0 %v2941_v5 }
 0x12b   :  { %v1184_v33 = vmax.f32 %v1183_v62, %v864_v19  ;;  %1181 = vmax.xlane.f32.xlu0 %v1180_v16  ;;  %1112 = vmatprep.mubr.bf16.mxu1 %v3945_v26 }
 0x12c   :  { %v866_v22 = vpop.f32.mrf.mxu1  ;;  %v3200_v25 = vpop.f32.mrf.mxu0  ;;  %2424 = vmatprep.mubr.bf16.mxu0 %v2950_v6  ;;  %v1198_v6 = vmax.f32 %v3047_v40, %v3051_v43 }
 0x12d   :  { %v1185_v27 = vmax.f32 %v1184_v33, %v866_v22  ;;  %v1203_v33 = vmax.f32 %v3058_v48, %v3065_v52 }
 0x12e   :  { %v868_v39 = vpop.f32.mrf.mxu1  ;;  %v3203_v46 = vpop.f32.mrf.mxu0 }
 0x12f   :  { %v1189_v5 = vmax.f32 %v1188_v2, %v868_v39  ;;  %1186 = vmax.xlane.f32.xlu1 %v1185_v27 }
 0x130   :  { %v870_v1 = vpop.f32.mrf.mxu1  ;;  %v3207_v28 = vpop.f32.mrf.mxu0 }
 0x131   :  { %v1190_v31 = vmax.f32 %v1189_v5, %v870_v1 }
 0x132   :  { %v874_v62 = vpop.f32.mrf.mxu1  ;;  %1113 = vmatmul.mubr.bf16.gmra.mxu1 %v2709_v29  ;;  %v3210_v11 = vpop.f32.mrf.mxu0  ;;  %2425 = vmatmul.mubr.bf16.gmra.mxu0 %v2959_v7 }
 0x133   :  { %v1194_v3 = vmax.f32 %v1193_v60, %v874_v62  ;;  %1191 = vmax.xlane.f32.xlu1 %v1190_v31  ;;  %1122 = vmatprep.mubr.bf16.mxu1 %v3945_v26  ;;  %v1213_v62 = vmax.f32 %v3082_v54, %v3089_v32 }
 0x134   :  { %v876_v34 = vpop.f32.mrf.mxu1  ;;  %v3216_v36 = vpop.f32.mrf.mxu0  ;;  %2428 = vmatprep.mubr.bf16.mxu0 %v2968_v8  ;;  %v1208_v8 = vmax.f32 %v3071_v57, %v3075_v44 }
 0x135   :  { %v1195_v16 = vmax.f32 %v1194_v3, %v876_v34 }
 0x136   :  { %v878_v19 = vpop.f32.mrf.mxu1  ;;  %v3219_v2 = vpop.f32.mrf.mxu0 }
 0x137   :  { %v1199_v7 = vmax.f32 %v1198_v6, %v878_v19  ;;  %1196 = vmax.xlane.f32.xlu0 %v1195_v16 }
 0x138   :  { %v880_v22 = vpop.f32.mrf.mxu1  ;;  %v3223_v40 = vpop.f32.mrf.mxu0 }
 0x139   :  { %v1200_v43 = vmax.f32 %v1199_v7, %v880_v22  ;;  %v1223_v22 = vmax.f32 %v3106_v59, %v3113_v38 }
 0x13a   :  { %v884_v27 = vpop.f32.mrf.mxu1  ;;  %1123 = vmatmul.mubr.bf16.gmra.mxu1 %v2741_v37  ;;  %v3226_v39 = vpop.f32.mrf.mxu0  ;;  %2429 = vmatmul.mubr.bf16.gmra.mxu0 %v2977_v9 }
 0x13b   :  { %v1204_v60 = vmax.f32 %v1203_v33, %v884_v27  ;;  %1201 = vmax.xlane.f32.xlu1 %v1200_v43  ;;  %1132 = vmatprep.mubr.bf16.mxu1 %v3945_v26 }
 0x13c   :  { %v886_v48 = vpop.f32.mrf.mxu1  ;;  %v3232_v52 = vpop.f32.mrf.mxu0  ;;  %2432 = vmatprep.mubr.bf16.mxu0 %v2661_v18  ;;  %v1218_v18 = vmax.f32 %v3095_v20, %v3099_v58 }
 0x13d   :  { %v1205_v5 = vmax.f32 %v1204_v60, %v886_v48 }
 0x13e   :  { %v888_v1 = vpop.f32.mrf.mxu1  ;;  %v3235_v31 = vpop.f32.mrf.mxu0 }
 0x13f   :  { %v1209_v9 = vmax.f32 %v1208_v8, %v888_v1  ;;  %1206 = vmax.xlane.f32.xlu0 %v1205_v5 }
 0x140   :  { %v890_v6 = vpop.f32.mrf.mxu1  ;;  %v3239_v44 = vpop.f32.mrf.mxu0 }
 0x141   :  { %v1210_v57 = vmax.f32 %v1209_v9, %v890_v6 }
 0x142   :  { %v894_v3 = vpop.f32.mrf.mxu1  ;;  %1133 = vmatmul.mubr.bf16.gmra.mxu1 %v2765_v42  ;;  %v3242_v34 = vpop.f32.mrf.mxu0  ;;  %2433 = vmatmul.mubr.bf16.gmra.mxu0 %v2687_v24 }
 0x143   :  { %v1214_v16 = vmax.f32 %v1213_v62, %v894_v3  ;;  %1211 = vmax.xlane.f32.xlu1 %v1210_v57  ;;  %1142 = vmatprep.mubr.bf16.mxu1 %v3945_v26  ;;  %v1233_v62 = vmax.f32 %v3130_v61, %v3137_v53 }
 0x144   :  { %v896_v32 = vpop.f32.mrf.mxu1  ;;  %v3248_v54 = vpop.f32.mrf.mxu0  ;;  %2436 = vmatprep.mubr.bf16.mxu0 %v2709_v29  ;;  %v1228_v29 = vmax.f32 %v3119_v14, %v3123_v49 }
 0x145   :  { %v1215_v19 = vmax.f32 %v1214_v16, %v896_v32 }
 0x146   :  { %v898_v33 = vpop.f32.mrf.mxu1  ;;  %v3251_v7 = vpop.f32.mrf.mxu0 }
 0x147   :  { %v1219_v24 = vmax.f32 %v1218_v18, %v898_v33  ;;  %1216 = vmax.xlane.f32.xlu0 %v1215_v19  ;;  %v1243_v19 = vmax.f32 %v3154_v63, %v3161_v55 }
 0x148   :  { %v900_v43 = vpop.f32.mrf.mxu1  ;;  %v3255_v20 = vpop.f32.mrf.mxu0 }
 0x149   :  { %v1220_v58 = vmax.f32 %v1219_v24, %v900_v43 }
 0x14a   :  { %v904_v27 = vpop.f32.mrf.mxu1  ;;  %1143 = vmatmul.mubr.bf16.gmra.mxu1 %v2782_v45  ;;  %v3258_v8 = vpop.f32.mrf.mxu0  ;;  %2437 = vmatmul.mubr.bf16.gmra.mxu0 %v2741_v37 }
 0x14b   :  { %v1224_v60 = vmax.f32 %v1223_v22, %v904_v27  ;;  %1221 = vmax.xlane.f32.xlu1 %v1220_v58  ;;  %1152 = vmatprep.mubr.bf16.mxu1 %v3945_v26 }
 0x14c   :  { %v906_v38 = vpop.f32.mrf.mxu1  ;;  %v3264_v59 = vpop.f32.mrf.mxu0  ;;  %2440 = vmatprep.mubr.bf16.mxu0 %v2765_v42  ;;  %v1238_v42 = vmax.f32 %v3143_v51, %v3147_v41 }
 0x14d   :  { %v1225_v48 = vmax.f32 %v1224_v60, %v906_v38 }
 0x14e   :  { %v908_v5 = vpop.f32.mrf.mxu1  ;;  %v3267_v1 = vpop.f32.mrf.mxu0 }
 0x14f   :  { %v1229_v37 = vmax.f32 %v1228_v29, %v908_v5  ;;  %1226 = vmax.xlane.f32.xlu0 %v1225_v48  ;;  %v1253_v29 = vmax.f32 %v3178_v30, %v3185_v13  ;;  %v1263_v13 = vmax.f32 %v3194_v4, %v3200_v25  ;;  %v1273_v25 = vmax.f32 %v3210_v11, %v3216_v36 }
 0x150   :  { %v910_v9 = vpop.f32.mrf.mxu1  ;;  %v3271_v14 = vpop.f32.mrf.mxu0  ;;  %v1283_v36 = vmax.f32 %v3226_v39, %v3232_v52  ;;  %v1293_v39 = vmax.f32 %v3242_v34, %v3248_v54  ;;  %v1303_v34 = vmax.f32 %v3258_v8, %v3264_v59 }
 0x151   :  { %v1230_v49 = vmax.f32 %v1229_v37, %v910_v9 }
 0x152   :  { %v914_v6 = vpop.f32.mrf.mxu1  ;;  %1153 = vmatmul.mubr.bf16.gmra.mxu1 %v2796_v47  ;;  %v3274_v57 = vpop.f32.mrf.mxu0  ;;  %2441 = vmatmul.mubr.bf16.gmra.mxu0 %v2782_v45 }
 0x153   :  { %v1234_v3 = vmax.f32 %v1233_v62, %v914_v6  ;;  %1231 = vmax.xlane.f32.xlu1 %v1230_v49  ;;  %1162 = vmatprep.mubr.bf16.mxu1 %v3945_v26 }
 0x154   :  { %v916_v53 = vpop.f32.mrf.mxu1  ;;  %v3280_v61 = vpop.f32.mrf.mxu0  ;;  %2444 = vmatprep.mubr.bf16.mxu0 %v2796_v47  ;;  %v1248_v47 = vmax.f32 %v3167_v56, %v3173_v0  ;;  %v1258_v0 = vmax.f32 %v3187_v35, %v3191_v23  ;;  %v1268_v35 = vmax.f32 %v3203_v46, %v3207_v28  ;;  %v1278_v28 = vmax.f32 %v3219_v2, %v3223_v40 }
 0x155   :  { %v1235_v18 = vmax.f32 %v1234_v3, %v916_v53  ;;  %v1288_v40 = vmax.f32 %v3235_v31, %v3239_v44  ;;  %v1298_v31 = vmax.f32 %v3251_v7, %v3255_v20  ;;  %v1308_v7 = vmax.f32 %v3267_v1, %v3271_v14 }
 0x156   :  { %v918_v16 = vpop.f32.mrf.mxu1  ;;  %v3283_v32 = vpop.f32.mrf.mxu0  ;;  %v1313_v8 = vmax.f32 %v3274_v57, %v3280_v61 }
 0x157   :  { %v1239_v45 = vmax.f32 %v1238_v42, %v918_v16  ;;  %1236 = vmax.xlane.f32.xlu0 %v1235_v18 }
 0x158   :  { %v920_v33 = vpop.f32.mrf.mxu1  ;;  %v3287_v41 = vpop.f32.mrf.mxu0 }
 0x159   :  { %v1240_v51 = vmax.f32 %v1239_v45, %v920_v33  ;;  %v1318_v1 = vmax.f32 %v3283_v32, %v3287_v41 }
 0x15a   :  { %v924_v22 = vpop.f32.mrf.mxu1  ;;  %1163 = vmatmul.mubr.bf16.gmra.mxu1 %v2813_v50  ;;  %v3290_v26 = vpop.f32.mrf.mxu0  ;;  %2445 = vmatmul.mubr.bf16.gmra.mxu0 %v2813_v50 }
 0x15b   :  { %v1244_v24 = vmax.f32 %v1243_v19, %v924_v22  ;;  %1241 = vmax.xlane.f32.xlu1 %v1240_v51 }
 0x15c   :  { %v926_v43 = vpop.f32.mrf.mxu1  ;;  %v3295_v55 = vpop.f32.mrf.mxu0 }
 0x15d   :  { %v1245_v63 = vmax.f32 %v1244_v24, %v926_v43  ;;  %v1323_v57 = vmax.f32 %v3290_v26, %v3295_v55 }
 0x15e   :  { %v928_v58 = vpop.f32.mrf.mxu1  ;;  %v3297_v27 = vpop.f32.mrf.mxu0 }
 0x15f   :  { %v1249_v60 = vmax.f32 %v1248_v47, %v928_v58  ;;  %1246 = vmax.xlane.f32.xlu0 %v1245_v63 }
 0x160   :  { %v930_v38 = vpop.f32.mrf.mxu1  ;;  %v3301_v48 = vpop.f32.mrf.mxu0 }
 0x161   :  { %v1250_v50 = vmax.f32 %v1249_v60, %v930_v38  ;;  %v1328_v32 = vmax.f32 %v3297_v27, %v3301_v48 }
 0x162   :  { %v934_v5 = vpop.f32.mrf.mxu1  ;;  %v3303_v56 = vpop.f32.mrf.mxu0 }
 0x163   :  { %v1254_v62 = vmax.f32 %v1253_v29, %v934_v5  ;;  %1251 = vmax.xlane.f32.xlu1 %v1250_v50 }
 0x164   :  { %v936_v37 = vpop.f32.mrf.mxu1  ;;  %v3307_v9 = vpop.f32.mrf.mxu0 }
 0x165   :  { %v1255_v49 = vmax.f32 %v1254_v62, %v936_v37  ;;  %v1333_v26 = vmax.f32 %v3303_v56, %v3307_v9 }
 0x166   :  { %v938_v6 = vpop.f32.mrf.mxu1  ;;  %v3309_v30 = vpop.f32.mrf.mxu0 }
 0x167   :  { %v1259_v42 = vmax.f32 %v1258_v0, %v938_v6  ;;  %1256 = vmax.xlane.f32.xlu0 %v1255_v49 }
 0x168   :  { %v940_v3 = vpop.f32.mrf.mxu1  ;;  %v3313_v53 = vpop.f32.mrf.mxu0 }
 0x169   :  { %v1260_v18 = vmax.f32 %v1259_v42, %v940_v3  ;;  %v1338_v27 = vmax.f32 %v3309_v30, %v3313_v53 }
 0x16a   :  { %v944_v16 = vpop.f32.mrf.mxu1  ;;  %v3315_v23 = vpop.f32.mrf.mxu0 }
 0x16b   :  { %v1264_v19 = vmax.f32 %v1263_v13, %v944_v16  ;;  %1261 = vmax.xlane.f32.xlu1 %v1260_v18 }
 0x16c   :  { %v946_v45 = vpop.f32.mrf.mxu1  ;;  %v3319_v33 = vpop.f32.mrf.mxu0 }
 0x16d   :  { %v1265_v51 = vmax.f32 %v1264_v19, %v946_v45  ;;  %v1343_v56 = vmax.f32 %v3315_v23, %v3319_v33 }
 0x16e   :  { %v948_v22 = vpop.f32.mrf.mxu1  ;;  %v3321_v4 = vpop.f32.mrf.mxu0 }
 0x16f   :  { %v1269_v47 = vmax.f32 %v1268_v35, %v948_v22  ;;  %1266 = vmax.xlane.f32.xlu0 %v1265_v51 }
 0x170   :  { %v950_v24 = vpop.f32.mrf.mxu1  ;;  %v3325_v43 = vpop.f32.mrf.mxu0 }
 0x171   :  { %v1270_v63 = vmax.f32 %v1269_v47, %v950_v24  ;;  %v1348_v30 = vmax.f32 %v3321_v4, %v3325_v43 }
 0x172   :  { %v954_v58 = vpop.f32.mrf.mxu1  ;;  %v3327_v46 = vpop.f32.mrf.mxu0 }
 0x173   :  { %v1274_v29 = vmax.f32 %v1273_v25, %v954_v58  ;;  %1271 = vmax.xlane.f32.xlu1 %v1270_v63 }
 0x174   :  { %v956_v60 = vpop.f32.mrf.mxu1  ;;  %v3331_v38 = vpop.f32.mrf.mxu0 }
 0x175   :  { %v1275_v50 = vmax.f32 %v1274_v29, %v956_v60  ;;  %v1353_v23 = vmax.f32 %v3327_v46, %v3331_v38 }
 0x176   :  { %v958_v5 = vpop.f32.mrf.mxu1  ;;  %v3333_v11 = vpop.f32.mrf.mxu0 }
 0x177   :  { %v1279_v0 = vmax.f32 %v1278_v28, %v958_v5  ;;  %1276 = vmax.xlane.f32.xlu0 %v1275_v50 }
 0x178   :  { %v960_v62 = vpop.f32.mrf.mxu1  ;;  %v3337_v37 = vpop.f32.mrf.mxu0 }
 0x179   :  { %v1280_v49 = vmax.f32 %v1279_v0, %v960_v62  ;;  %v1358_v4 = vmax.f32 %v3333_v11, %v3337_v37 }
 0x17a   :  { %v964_v6 = vpop.f32.mrf.mxu1  ;;  %v3339_v2 = vpop.f32.mrf.mxu0 }
 0x17b   :  { %v1284_v13 = vmax.f32 %v1283_v36, %v964_v6  ;;  %1281 = vmax.xlane.f32.xlu1 %v1280_v49 }
 0x17c   :  { %v966_v42 = vpop.f32.mrf.mxu1  ;;  %v3343_v3 = vpop.f32.mrf.mxu0 }
 0x17d   :  { %v1285_v18 = vmax.f32 %v1284_v13, %v966_v42  ;;  %v1363_v46 = vmax.f32 %v3339_v2, %v3343_v3 }
 0x17e   :  { %v968_v16 = vpop.f32.mrf.mxu1  ;;  %v3347_v19 = vpop.f32.mrf.mxu0 }
 0x17f   :  { %v1289_v52 = vmax.f32 %v1288_v40, %v968_v16  ;;  %1286 = vmax.xlane.f32.xlu0 %v1285_v18 }
 0x180   :  { %v970_v35 = vpop.f32.mrf.mxu1  ;;  %v3351_v25 = vpop.f32.mrf.mxu0 }
 0x181   :  { %v1290_v45 = vmax.f32 %v1289_v52, %v970_v35  ;;  %v1368_v11 = vmax.f32 %v3347_v19, %v3351_v25 }
 0x182   :  { %v974_v51 = vpop.f32.mrf.mxu1  ;;  %v3355_v58 = vpop.f32.mrf.mxu0 }
 0x183   :  { %v1294_v44 = vmax.f32 %v1293_v39, %v974_v51  ;;  %1291 = vmax.xlane.f32.xlu1 %v1290_v45 }
 0x184   :  { %v976_v22 = vpop.f32.mrf.mxu1  ;;  %v3359_v50 = vpop.f32.mrf.mxu0 }
 0x185   :  { %v1295_v47 = vmax.f32 %v1294_v44, %v976_v22 }
 0x186   :  { %v978_v24 = vpop.f32.mrf.mxu1  ;;  %v3363_v62 = vpop.f32.mrf.mxu0 }
 0x187   :  { %v1299_v54 = vmax.f32 %v1298_v31, %v978_v24  ;;  %1296 = vmax.xlane.f32.xlu0 %v1295_v47 }
 0x188   :  { %v980_v63 = vpop.f32.mrf.mxu1  ;;  %v3367_v13 = vpop.f32.mrf.mxu0 }
 0x189   :  { %v1300_v28 = vmax.f32 %v1299_v54, %v980_v63 }
 0x18a   :  { %v984_v29 = vpop.f32.mrf.mxu1  ;;  %v3371_v16 = vpop.f32.mrf.mxu0 }
 0x18b   :  { %v1304_v20 = vmax.f32 %v1303_v34, %v984_v29  ;;  %1301 = vmax.xlane.f32.xlu1 %v1300_v28 }
 0x18c   :  { %v986_v60 = vpop.f32.mrf.mxu1  ;;  %v3375_v45 = vpop.f32.mrf.mxu0 }
 0x18d   :  { %v1305_v5 = vmax.f32 %v1304_v20, %v986_v60 }
 0x18e   :  { %v988_v36 = vpop.f32.mrf.mxu1  ;;  %v3379_v22 = vpop.f32.mrf.mxu0 }
 0x18f   :  { %v1309_v59 = vmax.f32 %v1308_v7, %v988_v36  ;;  %1306 = vmax.xlane.f32.xlu0 %v1305_v5 }
 0x190   :  { %v990_v0 = vpop.f32.mrf.mxu1  ;;  %v3383_v54 = vpop.f32.mrf.mxu0 }
 0x191   :  { %v1310_v49 = vmax.f32 %v1309_v59, %v990_v0 }
 0x192   :  { %v994_v6 = vpop.f32.mrf.mxu1  ;;  %v3387_v7 = vpop.f32.mrf.mxu0 }
 0x193   :  { %v1314_v14 = vmax.f32 %v1313_v8, %v994_v6  ;;  %1311 = vmax.xlane.f32.xlu1 %v1310_v49 }
 0x194   :  { %v996_v40 = vpop.f32.mrf.mxu1  ;;  %v3391_v36 = vpop.f32.mrf.mxu0 }
 0x195   :  { %v1315_v42 = vmax.f32 %v1314_v14, %v996_v40 }
 0x196   :  { %v998_v18 = vpop.f32.mrf.mxu1  ;;  %v3395_v49 = vpop.f32.mrf.mxu0 }
 0x197   :  { %v1319_v61 = vmax.f32 %v1318_v1, %v998_v18  ;;  %1316 = vmax.xlane.f32.xlu0 %v1315_v42 }
 0x198   :  { %v1000_v39 = vpop.f32.mrf.mxu1  ;;  %v3399_v40 = vpop.f32.mrf.mxu0 }
 0x199   :  { %v1320_v52 = vmax.f32 %v1319_v61, %v1000_v39 }
 0x19a   :  { %v1004_v35 = vpop.f32.mrf.mxu1  ;;  %v3403_v61 = vpop.f32.mrf.mxu0 }
 0x19b   :  { %v1324_v41 = vmax.f32 %v1323_v57, %v1004_v35  ;;  %1321 = vmax.xlane.f32.xlu1 %v1320_v52 }
 0x19c   :  { %v1006_v51 = vpop.f32.mrf.mxu1 }
 0x19d   :  { %v1325_v31 = vmax.f32 %v1324_v41, %v1006_v51 }
 0x19e   :  { %v1008_v44 = vpop.f32.mrf.mxu1 }
 0x19f   :  { %v1329_v55 = vmax.f32 %v1328_v32, %v1008_v44  ;;  %1326 = vmax.xlane.f32.xlu0 %v1325_v31  ;;  %v733_v32 = vpop.f32.mrf.mxu0  ;;  %v1373_v44 = vmax.f32 %v3355_v58, %v3359_v50 }
 0x1a0   :  { %v1010_v47 = vpop.f32.mrf.mxu1 }
 0x1a1   :  { %v1330_v24 = vmax.f32 %v1329_v55, %v1010_v47  ;;  %v735_v3 = vpop.f32.mrf.mxu0 }
 0x1a2   :  { %v1014_v34 = vpop.f32.mrf.mxu1 }
 0x1a3   :  { %v1334_v48 = vmax.f32 %v1333_v26, %v1014_v34  ;;  %1331 = vmax.xlane.f32.xlu1 %v1330_v24  ;;  %v1378_v24 = vmax.f32 %v3363_v62, %v3367_v13  ;;  %v737_v19 = vpop.f32.mrf.mxu0 }
 0x1a4   :  { %v1016_v63 = vpop.f32.mrf.mxu1 }
 0x1a5   :  { %v1335_v28 = vmax.f32 %v1334_v48, %v1016_v63  ;;  %v1383_v63 = vmax.f32 %v3371_v16, %v3375_v45  ;;  %v3413_v58 = vpop.f32.mrf.mxu0  ;;  %v1393_v16 = vmax.f32 %v3387_v7, %v3391_v36  ;;  %v1403_v7 = vmax.f32 %v3403_v61, %v733_v32 }
 0x1a6   :  { %v1018_v29 = vpop.f32.mrf.mxu1 }
 0x1a7   :  { %v1339_v9 = vmax.f32 %v1338_v27, %v1018_v29  ;;  %1336 = vmax.xlane.f32.xlu0 %v1335_v28  ;;  %v3417_v13 = vpop.f32.mrf.mxu0 }
 0x1a8   :  { %v1020_v20 = vpop.f32.mrf.mxu1 }
 0x1a9   :  { %v1340_v60 = vmax.f32 %v1339_v9, %v1020_v20  ;;  %v1388_v9 = vmax.f32 %v3379_v22, %v3383_v54  ;;  %v1398_v22 = vmax.f32 %v3395_v49, %v3399_v40 }
 0x1aa   :  { %v1024_v5 = vpop.f32.mrf.mxu1 }
 0x1ab   :  { %v1344_v53 = vmax.f32 %v1343_v56, %v1024_v5  ;;  %1341 = vmax.xlane.f32.xlu1 %v1340_v60 }
 0x1ac   :  { %v1026_v8 = vpop.f32.mrf.mxu1 }
 0x1ad   :  { %v1345_v59 = vmax.f32 %v1344_v53, %v1026_v8 }
 0x1ae   :  { %v1028_v0 = vpop.f32.mrf.mxu1 }
 0x1af   :  { %v1349_v33 = vmax.f32 %v1348_v30, %v1028_v0  ;;  %1346 = vmax.xlane.f32.xlu0 %v1345_v59  ;;  %v3421_v30 = vpop.f32.mrf.mxu0 }
 0x1b0   :  { %v1030_v6 = vpop.f32.mrf.mxu1 }
 0x1b1   :  { %v1350_v1 = vmax.f32 %v1349_v33, %v1030_v6  ;;  %v3425_v0 = vpop.f32.mrf.mxu0 }
 0x1b2   :  { %v1034_v14 = vpop.f32.mrf.mxu1 }
 0x1b3   :  { %v1354_v43 = vmax.f32 %v1353_v23, %v1034_v14  ;;  %1351 = vmax.xlane.f32.xlu1 %v1350_v1  ;;  %v3427_v6 = vpop.f32.mrf.mxu0 }
 0x1b4   :  { %v1036_v42 = vpop.f32.mrf.mxu1 }
 0x1b5   :  { %v1355_v18 = vmax.f32 %v1354_v43, %v1036_v42  ;;  %v3430_v43 = vpop.f32.mrf.mxu0 }
 0x1b6   :  { %v1038_v57 = vpop.f32.mrf.mxu1 }
 0x1b7   :  { %v1359_v38 = vmax.f32 %v1358_v4, %v1038_v57  ;;  %1356 = vmax.xlane.f32.xlu0 %v1355_v18  ;;  %v1408_v18 = vmax.f32 %v735_v3, %v737_v19 }
 0x1b8   :  { %v1040_v39 = vpop.f32.mrf.mxu1 }
 0x1b9   :  { %v1360_v52 = vmax.f32 %v1359_v38, %v1040_v39 }
 0x1ba   :  { %v1044_v35 = vpop.f32.mrf.mxu1 }
 0x1bb   :  { %v1364_v37 = vmax.f32 %v1363_v46, %v1044_v35  ;;  %1361 = vmax.xlane.f32.xlu1 %v1360_v52  ;;  %v3432_v46 = vpop.f32.mrf.mxu0 }
 0x1bc   :  { %v1046_v41 = vpop.f32.mrf.mxu1 }
 0x1bd   :  { %v1365_v51 = vmax.f32 %v1364_v37, %v1046_v41  ;;  %v3434_v61 = vpop.f32.mrf.mxu0  ;;  %v3957_v37 = vmax.f32 %v2983_v10, %v2991_v12 }
 0x1be   :  { %v1048_v31 = vpop.f32.mrf.mxu1 }
 0x1bf   :  { %v1369_v2 = vmax.f32 %v1368_v11, %v1048_v31  ;;  %1366 = vmax.xlane.f32.xlu0 %v1365_v51  ;;  %v3439_v41 = vpop.f32.mrf.mxu0 }
 0x1c0   :  { %v1050_v26 = vpop.f32.mrf.mxu1 }
 0x1c1   :  { %v1370_v55 = vmax.f32 %v1369_v2, %v1050_v26  ;;  %v3958_v2 = vmax.f32 %v2997_v15, %v3001_v17  ;;  %v3444_v26 = vpop.f32.mrf.mxu0 }
 0x1c2   :  { %v1054_v47 = vpop.f32.mrf.mxu1 }
 0x1c3   :  { %v1374_v34 = vmax.f32 %v1373_v44, %v1054_v47  ;;  %1371 = vmax.xlane.f32.xlu1 %v1370_v55  ;;  %v3449_v19 = vpop.f32.mrf.mxu0 }
 0x1c4   :  { %v1056_v25 = vpop.f32.mrf.mxu1 }
 0x1c5   :  { %v1375_v27 = vmax.f32 %v1374_v34, %v1056_v25  ;;  %v3959_v34 = vld [vmem:[#allocation5_spill] sm:$0xff] }
 0x1c6   :  { %v1058_v48 = vpop.f32.mrf.mxu1  ;;  %v3960_v10 = vmax.f32 %v3007_v21, %v3959_v34  ;;  %v3964_v21 = vld [vmem:[#allocation8_spill] sm:$0xff] }
 0x1c7   :  { %v1379_v28 = vmax.f32 %v1378_v24, %v1058_v48  ;;  %1376 = vmax.xlane.f32.xlu0 %v1375_v27 }
 0x1c8   :  { %v1060_v50 = vpop.f32.mrf.mxu1 }
 0x1c9   :  { %v1380_v29 = vmax.f32 %v1379_v28, %v1060_v50  ;;  %v3962_v28 = vld [vmem:[#allocation7_spill] sm:$0xff]  ;;  %v3454_v50 = vpop.f32.mrf.mxu0 }
 0x1ca   :  { %v1064_v56 = vpop.f32.mrf.mxu1 }
 0x1cb   :  { %v1384_v62 = vmax.f32 %v1383_v63, %v1064_v56  ;;  %1381 = vmax.xlane.f32.xlu1 %v1380_v29  ;;  %v3961_v63 = vld [vmem:[#allocation6_spill] sm:$0xff] }
 0x1cc   :  { %v1066_v20 = vpop.f32.mrf.mxu1  ;;  %v3963_v15 = vmax.f32 %v3961_v63, %v3962_v28 }
 0x1cd   :  { %v1385_v60 = vmax.f32 %v1384_v62, %v1066_v20  ;;  %v3965_v20 = vld [vmem:[#allocation9_spill] sm:$0xff] }
 0x1ce   :  { %v1068_v5 = vpop.f32.mrf.mxu1 }
 0x1cf   :  { %v1389_v45 = vmax.f32 %v1388_v9, %v1068_v5  ;;  %1386 = vmax.xlane.f32.xlu0 %v1385_v60  ;;  %v3456_v9 = vpop.f32.mrf.mxu0  ;;  %v3966_v60 = vmax.f32 %v3964_v21, %v3965_v20 }
 0x1d0   :  { %v1070_v53 = vpop.f32.mrf.mxu1 }
 0x1d1   :  { %v1390_v8 = vmax.f32 %v1389_v45, %v1070_v53  ;;  %v3461_v53 = vpop.f32.mrf.mxu0 }
 0x1d2   :  { %v1074_v59 = vpop.f32.mrf.mxu1 }
 0x1d3   :  { %v1394_v54 = vmax.f32 %v1393_v16, %v1074_v59  ;;  %1391 = vmax.xlane.f32.xlu1 %v1390_v8  ;;  %v3967_v59 = vld [vmem:[#allocation10_spill] sm:$0xff] }
 0x1d4   :  { %v1076_v23 = vpop.f32.mrf.mxu1 }
 0x1d5   :  { %v1395_v33 = vmax.f32 %v1394_v54, %v1076_v23 }
 0x1d6   :  { %v1078_v1 = vpop.f32.mrf.mxu1 }
 0x1d7   :  { %v1399_v36 = vmax.f32 %v1398_v22, %v1078_v1  ;;  %1396 = vmax.xlane.f32.xlu0 %v1395_v33  ;;  %v3968_v22 = vld [vmem:[#allocation11_spill] sm:$0xff] }
 0x1d8   :  { %v1080_v14 = vpop.f32.mrf.mxu1  ;;  %v3969_v54 = vmax.f32 %v3967_v59, %v3968_v22  ;;  %v3986_v59 = vld [vmem:[#allocation23_spill] sm:$0xff] }
 0x1d9   :  { %v1400_v4 = vmax.f32 %v1399_v36, %v1080_v14  ;;  %v3970_v14 = vld [vmem:[#allocation12_spill] sm:$0xff] }
 0x1da   :  { %v1084_v42 = vpop.f32.mrf.mxu1 }
 0x1db   :  { %v1404_v49 = vmax.f32 %v1403_v7, %v1084_v42  ;;  %1401 = vmax.xlane.f32.xlu1 %v1400_v4  ;;  %v3466_v7 = vpop.f32.mrf.mxu0  ;;  %v3971_v4 = vld [vmem:[#allocation13_spill] sm:$0xff] }
 0x1dc   :  { %v1086_v40 = vpop.f32.mrf.mxu1  ;;  %v3972_v42 = vmax.f32 %v3970_v14, %v3971_v4  ;;  %v3988_v14 = vld [vmem:[#allocation24_spill] sm:$0xff]  ;;  %v3989_v4 = vld [vmem:[#allocation25_spill] sm:$0xff] }
 0x1dd   :  { %v1405_v57 = vmax.f32 %v1404_v49, %v1086_v40 }
 0x1de   :  { %v1088_v38 = vpop.f32.mrf.mxu1 }
 0x1df   :  { %v1409_v39 = vmax.f32 %v1408_v18, %v1088_v38  ;;  %1406 = vmax.xlane.f32.xlu0 %v1405_v57  ;;  %v3471_v57 = vpop.f32.mrf.mxu0 }
 0x1e0   :  { %v1090_v52 = vpop.f32.mrf.mxu1 }
 0x1e1   :  { %v1410_v35 = vmax.f32 %v1409_v39, %v1090_v52  ;;  %v3973_v39 = vld [vmem:[#allocation14_spill] sm:$0xff]  ;;  %v3974_v52 = vld [vmem:[#allocation15_spill] sm:$0xff] }
 0x1e2   :  { %v1094_v11 = vpop.f32.mrf.mxu1 }
 0x1e3   :  { %v1414_v32 = vmax.f32 %v3957_v37, %v1094_v11  ;;  %1411 = vmax.xlane.f32.xlu1 %v1410_v35  ;;  %v3975_v35 = vmax.f32 %v3973_v39, %v3974_v52  ;;  %v3476_v37 = vpop.f32.mrf.mxu0  ;;  %v3991_v52 = vld [vmem:[#allocation26_spill] sm:$0xff] }
 0x1e4   :  { %v1096_v51 = vpop.f32.mrf.mxu1 }
 0x1e5   :  { %v1415_v31 = vmax.f32 %v1414_v32, %v1096_v51 }
 0x1e6   :  { %v1098_v44 = vpop.f32.mrf.mxu1 }
 0x1e7   :  { %v1419_v3 = vmax.f32 %v3958_v2, %v1098_v44  ;;  %1416 = vmax.xlane.f32.xlu0 %v1415_v31  ;;  %v3976_v44 = vld [vmem:[#allocation16_spill] sm:$0xff]  ;;  %v3977_v2 = vld [vmem:[#allocation17_spill] sm:$0xff] }
 0x1e8   :  { %v1100_v55 = vpop.f32.mrf.mxu1 }
 0x1e9   :  { %v1420_v47 = vmax.f32 %v1419_v3, %v1100_v55  ;;  %v3978_v3 = vmax.f32 %v3976_v44, %v3977_v2 }
 0x1ea   :  { %v1104_v24 = vpop.f32.mrf.mxu1 }
 0x1eb   :  { %v1424_v12 = vmax.f32 %v3960_v10, %v1104_v24  ;;  %1421 = vmax.xlane.f32.xlu1 %v1420_v47  ;;  %v3481_v47 = vpop.f32.mrf.mxu0 }
 0x1ec   :  { %v1106_v25 = vpop.f32.mrf.mxu1 }
 0x1ed   :  { %v1425_v27 = vmax.f32 %v1424_v12, %v1106_v25  ;;  %v3979_v12 = vld [vmem:[#allocation18_spill] sm:$0xff]  ;;  %v3980_v25 = vld [vmem:[#allocation19_spill] sm:$0xff]  ;;  %v3486_v63 = vpop.f32.mrf.mxu0 }
 0x1ee   :  { %v1108_v48 = vpop.f32.mrf.mxu1 }
 0x1ef   :  { %v1429_v17 = vmax.f32 %v3963_v15, %v1108_v48  ;;  %1426 = vmax.xlane.f32.xlu0 %v1425_v27  ;;  %v3981_v27 = vmax.f32 %v3979_v12, %v3980_v25  ;;  %v3491_v20 = vpop.f32.mrf.mxu0 }
 0x1f0   :  { %v1110_v29 = vpop.f32.mrf.mxu1 }
 0x1f1   :  { %v1430_v56 = vmax.f32 %v1429_v17, %v1110_v29  ;;  %v3982_v29 = vld [vmem:[#allocation20_spill] sm:$0xff] }
 0x1f2   :  { %v1114_v62 = vpop.f32.mrf.mxu1 }
 0x1f3   :  { %v1434_v5 = vmax.f32 %v3966_v60, %v1114_v62  ;;  %1431 = vmax.xlane.f32.xlu1 %v1430_v56  ;;  %v3983_v56 = vld [vmem:[#allocation21_spill] sm:$0xff] }
 0x1f4   :  { %v1116_v16 = vpop.f32.mrf.mxu1  ;;  %v3984_v62 = vmax.f32 %v3982_v29, %v3983_v56 }
 0x1f5   :  { %v1435_v45 = vmax.f32 %v1434_v5, %v1116_v16  ;;  %v3493_v16 = vpop.f32.mrf.mxu0 }
 0x1f6   :  { %v1118_v8 = vpop.f32.mrf.mxu1 }
 0x1f7   :  { %v1439_v23 = vmax.f32 %v3969_v54, %v1118_v8  ;;  %1436 = vmax.xlane.f32.xlu0 %v1435_v45  ;;  %v3985_v8 = vld [vmem:[#allocation22_spill] sm:$0xff] }
 0x1f8   :  { %v1120_v33 = vpop.f32.mrf.mxu1  ;;  %v3987_v22 = vmax.f32 %v3985_v8, %v3986_v59 }
 0x1f9   :  { %v1440_v1 = vmax.f32 %v1439_v23, %v1120_v33 }
 0x1fa   :  { %v1124_v36 = vpop.f32.mrf.mxu1 }
 0x1fb   :  { %v1444_v18 = vmax.f32 %v3972_v42, %v1124_v36  ;;  %1441 = vmax.xlane.f32.xlu1 %v1440_v1  ;;  %v3498_v1 = vpop.f32.mrf.mxu0  ;;  %v3990_v42 = vmax.f32 %v3988_v14, %v3989_v4 }
 0x1fc   :  { %v1126_v49 = vpop.f32.mrf.mxu1 }
 0x1fd   :  { %v1445_v40 = vmax.f32 %v1444_v18, %v1126_v49 }
 0x1fe   :  { %v1128_v38 = vpop.f32.mrf.mxu1 }
 0x1ff   :  { %v1449_v11 = vmax.f32 %v3975_v35, %v1128_v38  ;;  %1446 = vmax.xlane.f32.xlu0 %v1445_v40  ;;  %v3503_v38 = vpop.f32.mrf.mxu0  ;;  %v3992_v35 = vld [vmem:[#allocation27_spill] sm:$0xff] }
 0x200   :  { %v1130_v32 = vpop.f32.mrf.mxu1 }
 0x201   :  { %v1450_v51 = vmax.f32 %v1449_v11, %v1130_v32  ;;  %v3993_v11 = vmax.f32 %v3991_v52, %v3992_v35  ;;  %v3508_v44 = vpop.f32.mrf.mxu0 }
 0x202   :  { %v1134_v31 = vpop.f32.mrf.mxu1 }
 0x203   :  { %v1454_v55 = vmax.f32 %v3978_v3, %v1134_v31  ;;  %1451 = vmax.xlane.f32.xlu1 %v1450_v51  ;;  %v3994_v3 = vld [vmem:[#allocation28_spill] sm:$0xff] }
 0x204   :  { %v1136_v24 = vpop.f32.mrf.mxu1 }
 0x205   :  { %v1455_v34 = vmax.f32 %v1454_v55, %v1136_v24  ;;  %v3995_v55 = vld [vmem:[#allocation29_spill] sm:$0xff] }
 0x206   :  { %v1138_v10 = vpop.f32.mrf.mxu1  ;;  %v3996_v24 = vmax.f32 %v3994_v3, %v3995_v55 }
 0x207   :  { %v1459_v48 = vmax.f32 %v3981_v27, %v1138_v10  ;;  %1456 = vmax.xlane.f32.xlu0 %v1455_v34  ;;  %v3513_v10 = vpop.f32.mrf.mxu0 }
 0x208   :  { %v1140_v28 = vpop.f32.mrf.mxu1 }
 0x209   :  { %v1460_v15 = vmax.f32 %v1459_v48, %v1140_v28  ;;  %v1177_v48 = vpop.xlane.xlu0 %1176  ;;  %v3997_v28 = vld [vmem:[#allocation30_spill] sm:$0xff]  ;;  %v3518_v56 = vpop.f32.mrf.mxu0 }
 0x20a   :  { %v1144_v17 = vpop.f32.mrf.mxu1 }
 0x20b   :  { %v1464_v21 = vmax.f32 %v3984_v62, %v1144_v17  ;;  %1461 = vmax.xlane.f32.xlu1 %v1460_v15  ;;  %v3998_v15 = vld [vmem:[#allocation31_spill] sm:$0xff] }
 0x20c   :  { %v1146_v60 = vpop.f32.mrf.mxu1  ;;  %v3999_v17 = vmax.f32 %v3997_v28, %v3998_v15 }
 0x20d   :  { %v1465_v5 = vmax.f32 %v1464_v21, %v1146_v60  ;;  %v1187_v60 = vpop.xlane.xlu1 %1186 }
 0x20e   :  { %v1148_v45 = vpop.f32.mrf.mxu1 }
 0x20f   :  { %v1469_v54 = vmax.f32 %v3987_v22, %v1148_v45  ;;  %1466 = vmax.xlane.f32.xlu0 %v1465_v5  ;;  %v3520_v5 = vpop.f32.mrf.mxu0  ;;  %v1182_v45 = vpop.xlane.xlu0 %1181  ;;  %v1910_v22 = vmul.f32 512.0, %v1177_v48 }
 0x210   :  { %v1150_v23 = vpop.f32.mrf.mxu1  ;;  %v1911_v59 = vmul.f32 512.0, %v1182_v45 }
 0x211   :  { %v1470_v33 = vmax.f32 %v1469_v54, %v1150_v23  ;;  %v3522_v8 = vpop.f32.mrf.mxu0  ;;  %v1192_v54 = vpop.xlane.xlu1 %1191 }
 0x212   :  { %v1154_v36 = vpop.f32.mrf.mxu1  ;;  %v1975_v14 = vsub.f32 %v1911_v59, %v3425_v0  ;;  %v1913_v4 = vmul.f32 512.0, %v1192_v54  ;;  %v1848_v0 = vld [vmem:[%s3898_s3 + $0x10] sm:$0xff] }
 0x213   :  { %v1474_v18 = vmax.f32 %v3990_v42, %v1154_v36  ;;  %1471 = vmax.xlane.f32.xlu1 %v1470_v33  ;;  %v3524_v23 = vpop.f32.mrf.mxu0  ;;  %v1912_v33 = vmul.f32 512.0, %v1187_v60  ;;  %v1197_v36 = vpop.xlane.xlu0 %1196  ;;  %v1974_v42 = vsub.f32 %v1910_v22, %v3417_v13 }
 0x214   :  { %v1156_v49 = vpop.f32.mrf.mxu1  ;;  %v1914_v35 = vmul.f32 512.0, %v1197_v36 }
 0x215   :  { %v1475_v40 = vmax.f32 %v1474_v18, %v1156_v49  ;;  %v1847_v18 = vld [vmem:[%s3898_s3 + $0x8] sm:$0xff]  ;;  %v1202_v49 = vpop.xlane.xlu1 %1201  ;;  %v1976_v52 = vsub.f32 %v1912_v33, %v3413_v58 }
 0x216   :  { %v1158_v39 = vpop.f32.mrf.mxu1  ;;  %v2039_v13 = vmul.f32 %v1975_v14, %v1847_v18 }
 0x217   :  { %v1479_v32 = vmax.f32 %v3993_v11, %v1158_v39  ;;  %1476 = vmax.xlane.f32.xlu0 %v1475_v40  ;;  %v3531_v40 = vpop.f32.mrf.mxu0  ;;  %v1846_v39 = vld [vmem:[%s3898_s3] sm:$0xff]  ;;  %v1207_v11 = vpop.xlane.xlu0 %1206  ;;  %v2040_v58 = vmul.f32 %v1976_v52, %v1848_v0 }
 0x218   :  { %v1160_v51 = vpop.f32.mrf.mxu1 }
 0x219   :  { %v1480_v31 = vmax.f32 %v1479_v32, %v1160_v51  ;;  %v1977_v32 = vsub.f32 %v1913_v4, %v3421_v30  ;;  %v1915_v51 = vmul.f32 512.0, %v1202_v49  ;;  %v1212_v3 = vpop.xlane.xlu1 %1211  ;;  %v3544_v55 = vpop.f32.mrf.mxu0  ;;  %v2104_v30 = vsel %vm2102_vm0, %v2039_v13, 0.0 }
 0x21a   :  { %v1164_v2 = vpop.f32.mrf.mxu1  ;;  %v1917_v28 = vmul.f32 512.0, %v1212_v3 }
 0x21b   :  { %v1484_v34 = vmax.f32 %v3996_v24, %v1164_v2  ;;  %1481 = vmax.xlane.f32.xlu1 %v1480_v31  ;;  %v2038_v31 = vmul.f32 %v1974_v42, %v1846_v39  ;;  %v1849_v2 = vld [vmem:[%s3898_s3 + $0x18] sm:$0xff]  ;;  %v1978_v24 = vsub.f32 %v1914_v35, %v3430_v43  ;;  %v1979_v48 = vsub.f32 %v1915_v51, %v3434_v61  ;;  %v3556_v43 = vpop.f32.mrf.mxu0  ;;  %v1852_v61 = vld [vmem:[%s3898_s3 + $0x30] sm:$0xff] }
 0x21c   :  { %v1166_v12 = vpop.f32.mrf.mxu1  ;;  %v1981_v14 = vsub.f32 %v1917_v28, %v3432_v46 }
 0x21d   :  { %v1485_v25 = vmax.f32 %v1484_v34, %v1166_v12  ;;  %v1916_v34 = vmul.f32 512.0, %v1207_v11  ;;  %v1850_v12 = vld [vmem:[%s3898_s3 + $0x20] sm:$0xff]  ;;  %v2103_v15 = vsel %vm2102_vm0, %v2038_v31, 0.0  ;;  %v3563_v54 = vpop.f32.mrf.mxu0 }
 0x21e   :  { %v1168_v27 = vpop.f32.mrf.mxu1  ;;  %v2105_v59 = vadd.f32 %v2104_v30, %v2103_v15  ;;  %v1854_v11 = vld [vmem:[%s3898_s3 + $0x40] sm:$0xff] }
 0x21f   :  { %v1489_v29 = vmax.f32 %v3999_v17, %v1168_v27  ;;  %1486 = vmax.xlane.f32.xlu0 %v1485_v25  ;;  %v1217_v25 = vpop.xlane.xlu0 %1216  ;;  %v2041_v27 = vmul.f32 %v1977_v32, %v1849_v2  ;;  %v1851_v17 = vld [vmem:[%s3898_s3 + $0x28] sm:$0xff]  ;;  %v1980_v60 = vsub.f32 %v1916_v34, %v3427_v6  ;;  %v1853_v6 = vld [vmem:[%s3898_s3 + $0x38] sm:$0xff]  ;;  %v3575_v46 = vpop.f32.mrf.mxu0 }
 0x220   :  { %v1170_v62 = vpop.f32.mrf.mxu1  ;;  %v1918_v45 = vmul.f32 512.0, %v1217_v25  ;;  %v2043_v36 = vmul.f32 %v1979_v48, %v1851_v17  ;;  %v2045_v51 = vmul.f32 %v1981_v14, %v1853_v6 }
 0x221   :  { %v1490_v21 = vmax.f32 %v1489_v29, %v1170_v62  ;;  %v1222_v29 = vpop.xlane.xlu1 %1221  ;;  %v2106_v62 = vsel %vm2102_vm0, %v2040_v58, 0.0  ;;  %v2108_v33 = vsel %vm2102_vm0, %v2041_v27, 0.0  ;;  %v2044_v39 = vmul.f32 %v1980_v60, %v1852_v61  ;;  %v1856_v27 = vld [vmem:[%s3898_s3 + $0x50] sm:$0xff] }
 0x222   :  { %v1919_v4 = vmul.f32 512.0, %v1222_v29  ;;  %v2107_v42 = vadd.f32 %v2106_v62, %v2105_v59  ;;  %v1982_v52 = vsub.f32 %v1918_v45, %v3444_v26  ;;  %v2112_v32 = vsel %vm2102_vm0, %v2043_v36, 0.0  ;;  %v1855_v26 = vld [vmem:[%s3898_s3 + $0x48] sm:$0xff] }
 0x223   :  { %1491 = vmax.xlane.f32.xlu1 %v1490_v21  ;;  %v2042_v21 = vmul.f32 %v1978_v24, %v1850_v12  ;;  %v1227_v22 = vpop.xlane.xlu0 %1226  ;;  %v2114_v24 = vsel %vm2102_vm0, %v2044_v39, 0.0  ;;  %v2116_v28 = vsel %vm2102_vm0, %v2045_v51, 0.0 }
 0x224   :  { %v1920_v35 = vmul.f32 512.0, %v1227_v22  ;;  %v2109_v0 = vadd.f32 %v2108_v33, %v2107_v42  ;;  %v1983_v31 = vsub.f32 %v1919_v4, %v3454_v50  ;;  %v2046_v34 = vmul.f32 %v1982_v52, %v1854_v11  ;;  %v3587_v50 = vpop.f32.mrf.mxu0  ;;  %v1858_v33 = vld [vmem:[%s3898_s3 + $0x60] sm:$0xff] }
 0x225   :  { %v1232_v18 = vpop.xlane.xlu1 %1231  ;;  %v2110_v49 = vsel %vm2102_vm0, %v2042_v21, 0.0 }
 0x226   :  { %v1921_v2 = vmul.f32 512.0, %v1232_v18  ;;  %v2111_v3 = vadd.f32 %v2110_v49, %v2109_v0  ;;  %v1984_v12 = vsub.f32 %v1920_v35, %v3439_v41  ;;  %v2047_v15 = vmul.f32 %v1983_v31, %v1855_v26  ;;  %v1857_v41 = vld [vmem:[%s3898_s3 + $0x58] sm:$0xff] }
 0x227   :  { %v1237_v13 = vpop.xlane.xlu0 %1236  ;;  %v2118_v60 = vsel %vm2102_vm0, %v2046_v34, 0.0 }
 0x228   :  { %v1922_v25 = vmul.f32 512.0, %v1237_v13  ;;  %v2113_v30 = vadd.f32 %v2112_v32, %v2111_v3  ;;  %v1985_v17 = vsub.f32 %v1921_v2, %v3449_v19  ;;  %v2048_v45 = vmul.f32 %v1984_v12, %v1856_v27  ;;  %v3599_v19 = vpop.f32.mrf.mxu0 }
 0x229   :  { %v1242_v58 = vpop.xlane.xlu1 %1241  ;;  %v2120_v14 = vsel %vm2102_vm0, %v2047_v15, 0.0 }
 0x22a   :  { %v1923_v29 = vmul.f32 512.0, %v1242_v58  ;;  %v2115_v62 = vadd.f32 %v2114_v24, %v2113_v30  ;;  %v1986_v59 = vsub.f32 %v1922_v25, %v3461_v53  ;;  %v2049_v4 = vmul.f32 %v1985_v17, %v1857_v41  ;;  %v1859_v53 = vld [vmem:[%s3898_s3 + $0x68] sm:$0xff]  ;;  %v3606_v39 = vpop.f32.mrf.mxu0  ;;  %v1861_v58 = vld [vmem:[%s3898_s3 + $0x78] sm:$0xff] }
 0x22b   :  { %v1247_v48 = vpop.xlane.xlu0 %1246  ;;  %v2122_v52 = vsel %vm2102_vm0, %v2048_v45, 0.0  ;;  %v1863_v41 = vld [vmem:[%s3898_s3 + $0x88] sm:$0xff] }
 0x22c   :  { %v1924_v61 = vmul.f32 512.0, %v1247_v48  ;;  %v2117_v22 = vadd.f32 %v2116_v28, %v2115_v62  ;;  %v1987_v42 = vsub.f32 %v1923_v29, %v3471_v57  ;;  %v2050_v35 = vmul.f32 %v1986_v59, %v1858_v33  ;;  %v1860_v57 = vld [vmem:[%s3898_s3 + $0x70] sm:$0xff] }
 0x22d   :  { %v1252_v21 = vpop.xlane.xlu1 %1251  ;;  %v2124_v51 = vsel %vm2102_vm0, %v2049_v4, 0.0 }
 0x22e   :  { %v1925_v6 = vmul.f32 512.0, %v1252_v21  ;;  %v2119_v18 = vadd.f32 %v2118_v60, %v2117_v22  ;;  %v1988_v0 = vsub.f32 %v1924_v61, %v3456_v9  ;;  %v2051_v31 = vmul.f32 %v1987_v42, %v1859_v53  ;;  %v3618_v9 = vpop.f32.mrf.mxu0 }
 0x22f   :  { %v1257_v36 = vpop.xlane.xlu0 %1256  ;;  %v2126_v34 = vsel %vm2102_vm0, %v2050_v35, 0.0 }
 0x230   :  { %v1926_v11 = vmul.f32 512.0, %v1257_v36  ;;  %v2121_v13 = vadd.f32 %v2120_v14, %v2119_v18  ;;  %v1989_v2 = vsub.f32 %v1925_v6, %v3466_v7  ;;  %v2052_v12 = vmul.f32 %v1988_v0, %v1860_v57  ;;  %v1862_v7 = vld [vmem:[%s3898_s3 + $0x80] sm:$0xff]  ;;  %v1865_v18 = vld [vmem:[%s3898_s3 + $0x98] sm:$0xff] }
 0x231   :  { %v1262_v49 = vpop.xlane.xlu1 %1261  ;;  %v2128_v28 = vsel %vm2102_vm0, %v2051_v31, 0.0 }
 0x232   :  { %v1927_v3 = vmul.f32 512.0, %v1262_v49  ;;  %v2123_v26 = vadd.f32 %v2122_v52, %v2121_v13  ;;  %v1990_v25 = vsub.f32 %v1926_v11, %v3481_v47  ;;  %v2053_v15 = vmul.f32 %v1989_v2, %v1861_v58  ;;  %v3630_v47 = vpop.f32.mrf.mxu0 }
 0x233   :  { %v1267_v32 = vpop.xlane.xlu0 %1266  ;;  %v2130_v60 = vsel %vm2102_vm0, %v2052_v12, 0.0 }
 0x234   :  { %v1928_v30 = vmul.f32 512.0, %v1267_v32  ;;  %v2125_v27 = vadd.f32 %v2124_v51, %v2123_v26  ;;  %v1991_v17 = vsub.f32 %v1927_v3, %v3491_v20  ;;  %v2054_v45 = vmul.f32 %v1990_v25, %v1862_v7  ;;  %v1864_v20 = vld [vmem:[%s3898_s3 + $0x90] sm:$0xff] }
 0x235   :  { %v1272_v24 = vpop.xlane.xlu1 %1271  ;;  %v2132_v36 = vsel %vm2102_vm0, %v2053_v15, 0.0 }
 0x236   :  { %v1929_v29 = vmul.f32 512.0, %v1272_v24  ;;  %v2127_v62 = vadd.f32 %v2126_v34, %v2125_v27  ;;  %v1992_v59 = vsub.f32 %v1928_v30, %v3476_v37  ;;  %v2055_v14 = vmul.f32 %v1991_v17, %v1863_v41  ;;  %v3642_v37 = vpop.f32.mrf.mxu0  ;;  %v1868_v30 = vld [vmem:[%s3898_s3 + $0xb0] sm:$0xff] }
 0x237   :  { %v1277_v48 = vpop.xlane.xlu0 %1276  ;;  %v2134_v49 = vsel %vm2102_vm0, %v2054_v45, 0.0 }
 0x238   :  { %v1930_v61 = vmul.f32 512.0, %v1277_v48  ;;  %v2129_v22 = vadd.f32 %v2128_v28, %v2127_v62  ;;  %v1993_v4 = vsub.f32 %v1929_v29, %v3486_v63  ;;  %v2056_v52 = vmul.f32 %v1992_v59, %v1864_v20  ;;  %v1866_v63 = vld [vmem:[%s3898_s3 + $0xa0] sm:$0xff]  ;;  %v3649_v57 = vpop.f32.mrf.mxu0 }
 0x239   :  { %v1282_v21 = vpop.xlane.xlu1 %1281  ;;  %v2136_v32 = vsel %vm2102_vm0, %v2055_v14, 0.0  ;;  %v1870_v59 = vld [vmem:[%s3898_s3 + $0xc0] sm:$0xff] }
 0x23a   :  { %v1931_v42 = vmul.f32 512.0, %v1282_v21  ;;  %v2131_v6 = vadd.f32 %v2130_v60, %v2129_v22  ;;  %v1994_v35 = vsub.f32 %v1930_v61, %v3498_v1  ;;  %v2057_v51 = vmul.f32 %v1993_v4, %v1865_v18  ;;  %v1867_v1 = vld [vmem:[%s3898_s3 + $0xa8] sm:$0xff] }
 0x23b   :  { %v1287_v33 = vpop.xlane.xlu0 %1286  ;;  %v2138_v58 = vsel %vm2102_vm0, %v2056_v52, 0.0  ;;  %v1872_v52 = vld [vmem:[%s3898_s3 + $0xd0] sm:$0xff] }
 0x23c   :  { %v1932_v0 = vmul.f32 512.0, %v1287_v33  ;;  %v2133_v11 = vadd.f32 %v2132_v36, %v2131_v6  ;;  %v1995_v31 = vsub.f32 %v1931_v42, %v3508_v44  ;;  %v2058_v24 = vmul.f32 %v1994_v35, %v1866_v63  ;;  %v3661_v44 = vpop.f32.mrf.mxu0 }
 0x23d   :  { %v1292_v53 = vpop.xlane.xlu1 %1291  ;;  %v2140_v7 = vsel %vm2102_vm0, %v2057_v51, 0.0 }
 0x23e   :  { %v1933_v2 = vmul.f32 512.0, %v1292_v53  ;;  %v2135_v3 = vadd.f32 %v2134_v49, %v2133_v11  ;;  %v1996_v34 = vsub.f32 %v1932_v0, %v3493_v16  ;;  %v2059_v48 = vmul.f32 %v1995_v31, %v1867_v1  ;;  %v1869_v16 = vld [vmem:[%s3898_s3 + $0xb8] sm:$0xff] }
 0x23f   :  { %v1297_v13 = vpop.xlane.xlu0 %1296  ;;  %v2142_v62 = vsel %vm2102_vm0, %v2058_v24, 0.0 }
 0x240   :  { %v1934_v12 = vmul.f32 512.0, %v1297_v13  ;;  %v2137_v25 = vadd.f32 %v2136_v32, %v2135_v3  ;;  %v1997_v28 = vsub.f32 %v1933_v2, %v3503_v38  ;;  %v2060_v41 = vmul.f32 %v1996_v34, %v1868_v30  ;;  %v3673_v38 = vpop.f32.mrf.mxu0 }
 0x241   :  { %v1302_v26 = vpop.xlane.xlu1 %1301  ;;  %v2144_v22 = vsel %vm2102_vm0, %v2059_v48, 0.0 }
 0x242   :  { %v1935_v15 = vmul.f32 512.0, %v1302_v26  ;;  %v2139_v17 = vadd.f32 %v2138_v58, %v2137_v25  ;;  %v1998_v21 = vsub.f32 %v1934_v12, %v3518_v56  ;;  %v2061_v20 = vmul.f32 %v1997_v28, %v1869_v16  ;;  %v1871_v56 = vld [vmem:[%s3898_s3 + $0xc8] sm:$0xff] }
 0x243   :  { %v1307_v27 = vpop.xlane.xlu0 %1306  ;;  %v2146_v42 = vsel %vm2102_vm0, %v2060_v41, 0.0 }
 0x244   :  { %v1936_v60 = vmul.f32 512.0, %v1307_v27  ;;  %v2141_v45 = vadd.f32 %v2140_v7, %v2139_v17  ;;  %v1999_v33 = vsub.f32 %v1935_v15, %v3522_v8  ;;  %v2062_v6 = vmul.f32 %v1998_v21, %v1870_v59  ;;  %v3685_v8 = vpop.f32.mrf.mxu0  ;;  %v1875_v7 = vld [vmem:[%s3898_s3 + $0xe8] sm:$0xff] }
 0x245   :  { %v1312_v29 = vpop.xlane.xlu1 %1311  ;;  %v2148_v0 = vsel %vm2102_vm0, %v2061_v20, 0.0 }
 0x246   :  { %v1937_v36 = vmul.f32 512.0, %v1312_v29  ;;  %v2143_v14 = vadd.f32 %v2142_v62, %v2141_v45  ;;  %v2000_v18 = vsub.f32 %v1936_v60, %v3513_v10  ;;  %v2063_v11 = vmul.f32 %v1999_v33, %v1871_v56  ;;  %v1873_v10 = vld [vmem:[%s3898_s3 + $0xd8] sm:$0xff]  ;;  %v3692_v31 = vpop.f32.mrf.mxu0 }
 0x247   :  { %v1317_v61 = vpop.xlane.xlu0 %1316  ;;  %v2150_v2 = vsel %vm2102_vm0, %v2062_v6, 0.0 }
 0x248   :  { %v1938_v53 = vmul.f32 512.0, %v1317_v61  ;;  %v2145_v49 = vadd.f32 %v2144_v22, %v2143_v14  ;;  %v2001_v63 = vsub.f32 %v1937_v36, %v3520_v5  ;;  %v2064_v3 = vmul.f32 %v2000_v18, %v1872_v52  ;;  %v1874_v5 = vld [vmem:[%s3898_s3 + $0xe0] sm:$0xff]  ;;  %v1877_v61 = vld [vmem:[%s3898_s3 + $0xf8] sm:$0xff]  ;;  %v1879_v52 = vld [vmem:[%s3898_s3 + $0x108] sm:$0xff] }
 0x249   :  { %v1322_v4 = vpop.xlane.xlu1 %1321  ;;  %v2152_v34 = vsel %vm2102_vm0, %v2063_v11, 0.0 }
 0x24a   :  { %v1939_v13 = vmul.f32 512.0, %v1322_v4  ;;  %v2147_v32 = vadd.f32 %v2146_v42, %v2145_v49  ;;  %v2002_v1 = vsub.f32 %v1938_v53, %v3531_v40  ;;  %v2065_v12 = vmul.f32 %v2001_v63, %v1873_v10  ;;  %v3704_v40 = vpop.f32.mrf.mxu0 }
 0x24b   :  { %v1327_v35 = vpop.xlane.xlu0 %1326  ;;  %v2154_v28 = vsel %vm2102_vm0, %v2064_v3, 0.0 }
 0x24c   :  { %v1940_v26 = vmul.f32 512.0, %v1327_v35  ;;  %v2149_v58 = vadd.f32 %v2148_v0, %v2147_v32  ;;  %v2003_v25 = vsub.f32 %v1939_v13, %v3556_v43  ;;  %v2066_v15 = vmul.f32 %v2002_v1, %v1874_v5  ;;  %v1876_v43 = vld [vmem:[%s3898_s3 + $0xf0] sm:$0xff] }
 0x24d   :  { %v1332_v51 = vpop.xlane.xlu1 %1331  ;;  %v2156_v41 = vsel %vm2102_vm0, %v2065_v12, 0.0 }
 0x24e   :  { %v1941_v30 = vmul.f32 512.0, %v1332_v51  ;;  %v2151_v27 = vadd.f32 %v2150_v2, %v2149_v58  ;;  %v2004_v17 = vsub.f32 %v1940_v26, %v3524_v23  ;;  %v2067_v21 = vmul.f32 %v2003_v25, %v1875_v7  ;;  %v3716_v23 = vpop.f32.mrf.mxu0 }
 0x24f   :  { %v1337_v24 = vpop.xlane.xlu0 %1336  ;;  %v2158_v20 = vsel %vm2102_vm0, %v2066_v15, 0.0 }
 0x250   :  { %v1942_v16 = vmul.f32 512.0, %v1337_v24  ;;  %v2153_v29 = vadd.f32 %v2152_v34, %v2151_v27  ;;  %v2005_v60 = vsub.f32 %v1941_v30, %v3544_v55  ;;  %v2068_v33 = vmul.f32 %v2004_v17, %v1876_v43  ;;  %v1878_v55 = vld [vmem:[%s3898_s3 + $0x100] sm:$0xff] }
 0x251   :  { %v1342_v48 = vpop.xlane.xlu1 %1341  ;;  %v2160_v42 = vsel %vm2102_vm0, %v2067_v21, 0.0  ;;  %v1882_v27 = vld [vmem:[%s3898_s3 + $0x120] sm:$0xff] }
 0x252   :  { %v1943_v45 = vmul.f32 512.0, %v1342_v48  ;;  %v2155_v59 = vadd.f32 %v2154_v28, %v2153_v29  ;;  %v2006_v36 = vsub.f32 %v1942_v16, %v3575_v46  ;;  %v2069_v6 = vmul.f32 %v2005_v60, %v1877_v61  ;;  %v3728_v46 = vpop.f32.mrf.mxu0 }
 0x253   :  { %v1347_v62 = vpop.xlane.xlu0 %1346  ;;  %v2162_v0 = vsel %vm2102_vm0, %v2068_v33, 0.0 }
 0x254   :  { %v1944_v14 = vmul.f32 512.0, %v1347_v62  ;;  %v2157_v56 = vadd.f32 %v2156_v41, %v2155_v59  ;;  %v2007_v18 = vsub.f32 %v1943_v45, %v3599_v19  ;;  %v2070_v11 = vmul.f32 %v2006_v36, %v1878_v55  ;;  %v1880_v19 = vld [vmem:[%s3898_s3 + $0x110] sm:$0xff]  ;;  %v3735_v51 = vpop.f32.mrf.mxu0 }
 0x255   :  { %v1352_v22 = vpop.xlane.xlu1 %1351  ;;  %v2164_v2 = vsel %vm2102_vm0, %v2069_v6, 0.0  ;;  %v1884_v45 = vld [vmem:[%s3898_s3 + $0x130] sm:$0xff] }
 0x256   :  { %v1945_v53 = vmul.f32 512.0, %v1352_v22  ;;  %v2159_v49 = vadd.f32 %v2158_v20, %v2157_v56  ;;  %v2008_v63 = vsub.f32 %v1944_v14, %v3563_v54  ;;  %v2071_v3 = vmul.f32 %v2007_v18, %v1879_v52  ;;  %v1881_v54 = vld [vmem:[%s3898_s3 + $0x118] sm:$0xff]  ;;  %v1886_v18 = vld [vmem:[%s3898_s3 + $0x140] sm:$0xff] }
 0x257   :  { %v1357_v4 = vpop.xlane.xlu0 %1356  ;;  %v2166_v24 = vsel %vm2102_vm0, %v2070_v11, 0.0 }
 0x258   :  { %v1946_v13 = vmul.f32 512.0, %v1357_v4  ;;  %v2161_v32 = vadd.f32 %v2160_v42, %v2159_v49  ;;  %v2009_v1 = vsub.f32 %v1945_v53, %v3587_v50  ;;  %v2072_v34 = vmul.f32 %v2008_v63, %v1880_v19  ;;  %v3747_v50 = vpop.f32.mrf.mxu0 }
 0x259   :  { %v1362_v35 = vpop.xlane.xlu1 %1361  ;;  %v2168_v48 = vsel %vm2102_vm0, %v2071_v3, 0.0 }
 0x25a   :  { %v1947_v26 = vmul.f32 512.0, %v1362_v35  ;;  %v2163_v58 = vadd.f32 %v2162_v0, %v2161_v32  ;;  %v2010_v12 = vsub.f32 %v1946_v13, %v3618_v9  ;;  %v2073_v28 = vmul.f32 %v2009_v1, %v1881_v54  ;;  %v1883_v9 = vld [vmem:[%s3898_s3 + $0x128] sm:$0xff] }
 0x25b   :  { %v1367_v10 = vpop.xlane.xlu0 %1366  ;;  %v2170_v43 = vsel %vm2102_vm0, %v2072_v34, 0.0  ;;  %v1889_v34 = vld [vmem:[%s3898_s3 + $0x158] sm:$0xff] }
 0x25c   :  { %v1948_v25 = vmul.f32 512.0, %v1367_v10  ;;  %v2165_v30 = vadd.f32 %v2164_v2, %v2163_v58  ;;  %v2011_v15 = vsub.f32 %v1947_v26, %v3642_v37  ;;  %v2074_v62 = vmul.f32 %v2010_v12, %v1882_v27  ;;  %v3759_v37 = vpop.f32.mrf.mxu0 }
 0x25d   :  { %v1372_v5 = vpop.xlane.xlu1 %1371  ;;  %v2172_v61 = vsel %vm2102_vm0, %v2073_v28, 0.0 }
 0x25e   :  { %v1949_v17 = vmul.f32 512.0, %v1372_v5  ;;  %v2167_v16 = vadd.f32 %v2166_v24, %v2165_v30  ;;  %v2012_v41 = vsub.f32 %v1948_v25, %v3606_v39  ;;  %v2075_v22 = vmul.f32 %v2011_v15, %v1883_v9  ;;  %v1885_v39 = vld [vmem:[%s3898_s3 + $0x138] sm:$0xff] }
 0x25f   :  { %v1377_v7 = vpop.xlane.xlu0 %1376  ;;  %v2174_v56 = vsel %vm2102_vm0, %v2074_v62, 0.0 }
 0x260   :  { %v1950_v21 = vmul.f32 512.0, %v1377_v7  ;;  %v2169_v60 = vadd.f32 %v2168_v48, %v2167_v16  ;;  %v2013_v20 = vsub.f32 %v1949_v17, %v3630_v47  ;;  %v2076_v55 = vmul.f32 %v2012_v41, %v1884_v45  ;;  %v3771_v47 = vpop.f32.mrf.mxu0 }
 0x261   :  { %v1382_v29 = vpop.xlane.xlu1 %1381  ;;  %v2176_v49 = vsel %vm2102_vm0, %v2075_v22, 0.0 }
 0x262   :  { %v1951_v33 = vmul.f32 512.0, %v1382_v29  ;;  %v2171_v36 = vadd.f32 %v2170_v43, %v2169_v60  ;;  %v2014_v4 = vsub.f32 %v1950_v21, %v3661_v44  ;;  %v2077_v52 = vmul.f32 %v2013_v20, %v1885_v39  ;;  %v1887_v44 = vld [vmem:[%s3898_s3 + $0x148] sm:$0xff]  ;;  %v3778_v13 = vpop.f32.mrf.mxu0 }
 0x263   :  { %v1387_v59 = vpop.xlane.xlu0 %1386  ;;  %v2178_v32 = vsel %vm2102_vm0, %v2076_v55, 0.0  ;;  %v1891_v43 = vld [vmem:[%s3898_s3 + $0x168] sm:$0xff] }
 0x264   :  { %v1952_v42 = vmul.f32 512.0, %v1387_v59  ;;  %v2173_v6 = vadd.f32 %v2172_v61, %v2171_v36  ;;  %v2015_v35 = vsub.f32 %v1951_v33, %v3685_v8  ;;  %v2078_v19 = vmul.f32 %v2014_v4, %v1886_v18  ;;  %v1888_v8 = vld [vmem:[%s3898_s3 + $0x150] sm:$0xff] }
 0x265   :  { %v1392_v14 = vpop.xlane.xlu1 %1391  ;;  %v2180_v26 = vsel %vm2102_vm0, %v2077_v52, 0.0 }
 0x266   :  { %v1953_v0 = vmul.f32 512.0, %v1392_v14  ;;  %v2175_v11 = vadd.f32 %v2174_v56, %v2173_v6  ;;  %v2016_v10 = vsub.f32 %v1952_v42, %v3649_v57  ;;  %v2079_v58 = vmul.f32 %v2015_v35, %v1887_v44  ;;  %v3790_v57 = vpop.f32.mrf.mxu0  ;;  %v1893_v14 = vld [vmem:[%s3898_s3 + $0x178] sm:$0xff] }
 0x267   :  { %v1397_v53 = vpop.xlane.xlu0 %1396  ;;  %v2182_v25 = vsel %vm2102_vm0, %v2078_v19, 0.0 }
 0x268   :  { %v1954_v2 = vmul.f32 512.0, %v1397_v53  ;;  %v2177_v3 = vadd.f32 %v2176_v49, %v2175_v11  ;;  %v2017_v54 = vsub.f32 %v1953_v0, %v3673_v38  ;;  %v2080_v30 = vmul.f32 %v2016_v10, %v1888_v8  ;;  %v1890_v38 = vld [vmem:[%s3898_s3 + $0x160] sm:$0xff]  ;;  %v1896_v8 = vld [vmem:[%s3898_s3 + $0x190] sm:$0xff] }
 0x269   :  { %v1402_v63 = vpop.xlane.xlu1 %1401  ;;  %v2184_v15 = vsel %vm2102_vm0, %v2079_v58, 0.0  ;;  %v1894_v53 = vld [vmem:[%s3898_s3 + $0x180] sm:$0xff] }
 0x26a   :  { %v1955_v5 = vmul.f32 512.0, %v1402_v63  ;;  %v2179_v24 = vadd.f32 %v2178_v32, %v2177_v3  ;;  %v2018_v27 = vsub.f32 %v1954_v2, %v3704_v40  ;;  %v2081_v17 = vmul.f32 %v2017_v54, %v1889_v34  ;;  %v3802_v40 = vpop.f32.mrf.mxu0  ;;  %v1897_v34 = vld [vmem:[%s3898_s3 + $0x198] sm:$0xff] }
 0x26b   :  { %v1407_v1 = vpop.xlane.xlu0 %1406  ;;  %v2186_v41 = vsel %vm2102_vm0, %v2080_v30, 0.0 }
 0x26c   :  { %v1956_v7 = vmul.f32 512.0, %v1407_v1  ;;  %v2181_v48 = vadd.f32 %v2180_v26, %v2179_v24  ;;  %v2019_v16 = vsub.f32 %v1955_v5, %v3728_v46  ;;  %v2082_v21 = vmul.f32 %v2018_v27, %v1890_v38  ;;  %v1892_v46 = vld [vmem:[%s3898_s3 + $0x170] sm:$0xff] }
 0x26d   :  { %v1412_v12 = vpop.xlane.xlu1 %1411  ;;  %v2188_v22 = vsel %vm2102_vm0, %v2081_v17, 0.0 }
 0x26e   :  { %v1957_v9 = vmul.f32 512.0, %v1412_v12  ;;  %v2183_v29 = vadd.f32 %v2182_v25, %v2181_v48  ;;  %v2020_v60 = vsub.f32 %v1956_v7, %v3692_v31  ;;  %v2083_v20 = vmul.f32 %v2019_v16, %v1891_v43  ;;  %v1802_v31 = vpop.f32.mrf.mxu0  ;;  %v1898_v48 = vld [vmem:[%s3898_s3 + $0x1a0] sm:$0xff] }
 0x26f   :  { %v2190_v55 = vsel %vm2102_vm0, %v2082_v21, 0.0 }
 0x270   :  { %v1417_v28 = vpop.xlane.xlu0 %1416  ;;  %v2185_v59 = vadd.f32 %v2184_v15, %v2183_v29  ;;  %v2021_v33 = vsub.f32 %v1957_v9, %v3716_v23  ;;  %v2084_v4 = vmul.f32 %v2020_v60, %v1892_v46  ;;  %v3819_v49 = vpop.f32.mrf.mxu0  ;;  %v2192_v52 = vsel %vm2102_vm0, %v2083_v20, 0.0  ;;  %v1899_v29 = vld [vmem:[%s3898_s3 + $0x1a8] sm:$0xff] }
 0x271   :  { %v1958_v45 = vmul.f32 512.0, %v1417_v28 }
 0x272   :  { %v2187_v39 = vadd.f32 %v2186_v41, %v2185_v59  ;;  %v2085_v35 = vmul.f32 %v2021_v33, %v1893_v14  ;;  %v2194_v32 = vsel %vm2102_vm0, %v2084_v4, 0.0 }
 0x273   :  { %v2022_v42 = vsub.f32 %v1958_v45, %v3747_v50  ;;  %v1895_v50 = vld [vmem:[%s3898_s3 + $0x188] sm:$0xff]  ;;  %v1900_v45 = vld [vmem:[%s3898_s3 + $0x1b0] sm:$0xff] }
 0x274   :  { %v1422_v62 = vpop.xlane.xlu1 %1421  ;;  %v2189_v18 = vadd.f32 %v2188_v22, %v2187_v39  ;;  %v2196_v26 = vsel %vm2102_vm0, %v2085_v35, 0.0  ;;  %v1901_v39 = vld [vmem:[%s3898_s3 + $0x1b8] sm:$0xff]  ;;  %v1903_v35 = vld [vmem:[%s3898_s3 + $0x1c8] sm:$0xff] }
 0x275   :  { %v1959_v36 = vmul.f32 512.0, %v1422_v62  ;;  %v2086_v19 = vmul.f32 %v2022_v42, %v1894_v53  ;;  %v1902_v42 = vld [vmem:[%s3898_s3 + $0x1c0] sm:$0xff] }
 0x276   :  { %v2191_v44 = vadd.f32 %v2190_v55, %v2189_v18 }
 0x277   :  { %v2023_v0 = vsub.f32 %v1959_v36, %v3771_v47  ;;  %v1815_v47 = vpop.f32.mrf.mxu0  ;;  %v2198_v12 = vsel %vm2102_vm0, %v2086_v19, 0.0 }
 0x278   :  { %v1427_v61 = vpop.xlane.xlu0 %1426  ;;  %v2193_v3 = vadd.f32 %v2192_v52, %v2191_v44 }
 0x279   :  { %v1960_v6 = vmul.f32 512.0, %v1427_v61  ;;  %v2087_v58 = vmul.f32 %v2023_v0, %v1895_v50 }
 0x27a   :  { %v2195_v24 = vadd.f32 %v2194_v32, %v2193_v3  ;;  %v1904_v32 = vld [vmem:[%s3898_s3 + $0x1d0] sm:$0xff] }
 0x27b   :  { %v2024_v10 = vsub.f32 %v1960_v6, %v3735_v51  ;;  %v2200_v28 = vsel %vm2102_vm0, %v2087_v58, 0.0 }
 0x27c   :  { %v1432_v56 = vpop.xlane.xlu1 %1431  ;;  %v2197_v7 = vadd.f32 %v2196_v26, %v2195_v24  ;;  %v1906_v24 = vld [vmem:[%s3898_s3 + $0x1e0] sm:$0xff] }
 0x27d   :  { %v1961_v11 = vmul.f32 512.0, %v1432_v56  ;;  %v2088_v25 = vmul.f32 %v2024_v10, %v1896_v8 }
 0x27e   :  { %v2199_v9 = vadd.f32 %v2198_v12, %v2197_v7  ;;  %v1907_v7 = vld [vmem:[%s3898_s3 + $0x1e8] sm:$0xff] }
 0x27f   :  { %v2025_v54 = vsub.f32 %v1961_v11, %v3759_v37  ;;  %v2443_v37 = vpop.f32.mrf.mxu0 }
 0x280   :  { %v1437_v23 = vpop.xlane.xlu0 %1436  ;;  %v2201_v60 = vadd.f32 %v2200_v28, %v2199_v9 }
 0x281   :  { %v1962_v2 = vmul.f32 512.0, %v1437_v23  ;;  %v2089_v15 = vmul.f32 %v2025_v54, %v1897_v34  ;;  %v1818_v59 = vpop.f32.mrf.mxu0 }
 0x283   :  { %v2026_v30 = vsub.f32 %v1962_v2, %v3790_v57  ;;  %v2202_v57 = vsel %vm2102_vm0, %v2088_v25, 0.0  ;;  %v2204_v61 = vsel %vm2102_vm0, %v2089_v15, 0.0 }
 0x284   :  { %v1442_v63 = vpop.xlane.xlu1 %1441  ;;  %v2203_v36 = vadd.f32 %v2202_v57, %v2201_v60 }
 0x285   :  { %v1963_v5 = vmul.f32 512.0, %v1442_v63  ;;  %v2090_v62 = vmul.f32 %v2026_v30, %v1898_v48 }
 0x286   :  { %v2205_v4 = vadd.f32 %v2204_v61, %v2203_v36  ;;  %v1909_v61 = vld [vmem:[%s3898_s3 + $0x1f8] sm:$0xff] }
 0x287   :  { %v2027_v17 = vsub.f32 %v1963_v5, %v1802_v31  ;;  %v2206_v14 = vsel %vm2102_vm0, %v2090_v62, 0.0 }
 0x288   :  { %v1447_v1 = vpop.xlane.xlu0 %1446  ;;  %v2207_v52 = vadd.f32 %v2206_v14, %v2205_v4 }
 0x289   :  { %v1964_v27 = vmul.f32 512.0, %v1447_v1  ;;  %v2091_v22 = vmul.f32 %v2027_v17, %v1899_v29 }
 0x28b   :  { %v2028_v41 = vsub.f32 %v1964_v27, %v3778_v13  ;;  %v2446_v13 = vpop.f32.mrf.mxu0 }
 0x28c   :  { %v1452_v51 = vpop.xlane.xlu1 %1451 }
 0x28d   :  { %v1965_v16 = vmul.f32 512.0, %v1452_v51  ;;  %v2092_v56 = vmul.f32 %v2028_v41, %v1900_v45  ;;  %v1831_v0 = vpop.f32.mrf.mxu0 }
 0x28f   :  { %v2029_v20 = vsub.f32 %v1965_v16, %v3802_v40  ;;  %v2208_v40 = vsel %vm2102_vm0, %v2091_v22, 0.0  ;;  %v2210_v11 = vsel %vm2102_vm0, %v2092_v56, 0.0  ;;  %v2447_v26 = vpop.f32.mrf.mxu0 }
 0x290   :  { %v1457_v38 = vpop.xlane.xlu0 %1456  ;;  %v2209_v63 = vadd.f32 %v2208_v40, %v2207_v52 }
 0x291   :  { %v1966_v21 = vmul.f32 512.0, %v1457_v38  ;;  %v2093_v18 = vmul.f32 %v2029_v20, %v1901_v39  ;;  %v1834_v27 = vpop.f32.mrf.mxu0 }
 0x292   :  { %v2211_v1 = vadd.f32 %v2210_v11, %v2209_v63 }
 0x293   :  { %v2030_v31 = vsub.f32 %v1966_v21, %v1815_v47  ;;  %v2212_v10 = vsel %vm2102_vm0, %v2093_v18, 0.0  ;;  %v1905_v47 = vld [vmem:[%s3898_s3 + $0x1d8] sm:$0xff] }
 0x294   :  { %v1462_v43 = vpop.xlane.xlu1 %1461  ;;  %v2213_v5 = vadd.f32 %v2212_v10, %v2211_v1 }
 0x295   :  { %v1967_v33 = vmul.f32 512.0, %v1462_v43  ;;  %v2094_v44 = vmul.f32 %v2030_v31, %v1902_v42  ;;  %v1908_v43 = vld [vmem:[%s3898_s3 + $0x1f0] sm:$0xff]  ;;  %s2248_s3 = sshll.u32 %s2579_s9, 4  ;;  %s2249_s3 = int_to_ptr.vmem [resolvable:$true] %s2248_s3 }
 0x296   :  { %s2556_s12 = scalar_lea.vmem %s2249_s3, 128  ;;  %p2561_p1 = scmp.lt.s32.totalorder %s2249_s3, %s2249_s3 }
 0x297   :  { %v2031_v53 = vsub.f32 %v1967_v33, %v1818_v59  ;;  %v2214_v58 = vsel %vm2102_vm0, %v2094_v44, 0.0  ;;  %p2557_p0 = scmp.ne.s32.totalorder %s2249_s3, %s2556_s12  ;;  %p2562_p2 = scmp.lt.s32.totalorder %s2556_s12, %s2556_s12 }
 0x298   :  { %v1467_v46 = vpop.xlane.xlu0 %1466  ;;  %v2215_v30 = vadd.f32 %v2214_v58, %v2213_v5 }
 0x299   :  { %v1968_v55 = vmul.f32 512.0, %v1467_v46  ;;  %v2095_v2 = vmul.f32 %v2031_v53, %v1903_v35  ;;  %p2563_p3 = por %p2562_p2, %p2561_p1 }
 0x29b   :  { %v2032_v50 = vsub.f32 %v1968_v55, %v3819_v49  ;;  %v2216_v51 = vsel %vm2102_vm0, %v2095_v2, 0.0  ;;  %p2564_p4 = pnand %p2563_p3, %p2557_p0 }
 0x29c   :  { %v1472_v6 = vpop.xlane.xlu1 %1471  ;;  %v2217_v28 = vadd.f32 %v2216_v51, %v2215_v30 }
 0x29d   :  { %v1969_v23 = vmul.f32 512.0, %v1472_v6  ;;  %v2096_v49 = vmul.f32 %v2032_v50, %v1904_v32 }
 0x29f   :  { %v2033_v3 = vsub.f32 %v1969_v23, %v2443_v37  ;;  %v2218_v48 = vsel %vm2102_vm0, %v2096_v49, 0.0 }
 0x2a0   :  { %v1477_v19 = vpop.xlane.xlu0 %1476  ;;  %v2219_v29 = vadd.f32 %v2218_v48, %v2217_v28 }
 0x2a1   :  { %v1970_v8 = vmul.f32 512.0, %v1477_v19  ;;  %v2097_v12 = vmul.f32 %v2033_v3, %v1905_v47 }
 0x2a3   :  { %v2034_v54 = vsub.f32 %v1970_v8, %v1831_v0  ;;  %v2220_v17 = vsel %vm2102_vm0, %v2097_v12, 0.0 }
 0x2a4   :  { %v1482_v34 = vpop.xlane.xlu1 %1481  ;;  %v2221_v41 = vadd.f32 %v2220_v17, %v2219_v29 }
 0x2a5   :  { %v1971_v25 = vmul.f32 512.0, %v1482_v34  ;;  %v2098_v38 = vmul.f32 %v2034_v54, %v1906_v24 }
 0x2a7   :  { %v2035_v37 = vsub.f32 %v1971_v25, %v1834_v27  ;;  %v2222_v57 = vsel %vm2102_vm0, %v2098_v38, 0.0 }
 0x2a8   :  { %v1487_v15 = vpop.xlane.xlu0 %1486  ;;  %v2223_v46 = vadd.f32 %v2222_v57, %v2221_v41 }
 0x2a9   :  { %v2099_v16 = vmul.f32 %v2035_v37, %v1907_v7  ;;  %v1972_v9 = vmul.f32 512.0, %v1487_v15 }
 0x2ab   :  { %v2036_v62 = vsub.f32 %v1972_v9, %v2446_v13  ;;  %v2224_v60 = vsel %vm2102_vm0, %v2099_v16, 0.0 }
 0x2ac   :  { %v1492_v21 = vpop.xlane.xlu1 %1491  ;;  %v2225_v33 = vadd.f32 %v2224_v60, %v2223_v46 }
 0x2ad   :  { %v2100_v45 = vmul.f32 %v2036_v62, %v1908_v43  ;;  %v1973_v59 = vmul.f32 512.0, %v1492_v21 }
 0x2af   :  { %v2037_v22 = vsub.f32 %v1973_v59, %v2447_v26  ;;  %v2226_v20 = vsel %vm2102_vm0, %v2100_v45, 0.0 }
 0x2b0   :  { %v2227_v39 = vadd.f32 %v2226_v20, %v2225_v33 }
 0x2b1   :  { %v2101_v36 = vmul.f32 %v2037_v22, %v1909_v61 }
 0x2b3   :  { %v2228_v14 = vsel %vm2102_vm0, %v2101_v36, 0.0 }
 0x2b4   :  { %v2229_v13 = vadd.f32 %v2228_v14, %v2227_v39 }
 0x2b6   :  { %2230 = vadd.xlane.f32.xlu0 %v2229_v13 }
 0x33f   :  { %v2231_v56 = vpop.xlane.xlu0 %2230 }
 0x340   :  { %v2232_v31 = vrot.slane %v2231_v56, 4 }
 0x342   :  { %v2233_v55 = vadd.f32 %v2232_v31, %v2231_v56 }
 0x344   :  { %v2234_v4 = vrot.slane %v2233_v55, 2 }
 0x346   :  { %v2235_v42 = vadd.f32 %v2234_v4, %v2233_v55 }
 0x348   :  { %v2236_v6 = vrot.slane %v2235_v42, 1 }
 0x34a   :  { %v2237_v40 = vadd.f32 %v2236_v6, %v2235_v42 }
 0x34c   :  { %2464 = vpush %v2237_v40 }
 0x37d   :  { %s2465_s10 = spop %2464 }
 0x37e   :  { %s2239_s11 = smul.f32 10.0, %s2465_s10 }
 0x380   :  { %v2240_v18 = vstv %s2239_s11 }
 0x381   :  { %2241 = vst [vmem:[#allocation2] sm:$0xff] %v2240_v18 }
 0x382   :  { %2567 = shalt.err (!%p2564_p4)
}
 0x383   :  { %2251 = dma.vmem_to_hbm [thread:$0]  %s2249_s3, 128, %s3899_s4, [#allocation3]  }
 0x384   :  { %2576 = dma.done.wait [#allocation3], 128  }
 0x385   :  { %2577 = vsyncadd [#allocation3], 4294967168 }
 0x386   :  { %2255 = vsyncpa [#allocation3], 1 }

</bundles_post_ra>
